<compile_context>
chip_gen: v5e
topology: v5e:2x2
jax: 0.10.0
libtpu: 0.0.40
codegen_flags: <defaults>
</compile_context>

<pallas_src>
import numpy as np
import jax
import jax.numpy as jnp
from jax import lax
from jax.experimental import pallas as pl
from jax.experimental.pallas import tpu as pltpu


# ----------------------------------------------------------------------------
# Pallas kernel: one InverseDecodingLayer for one tile of batch elements
# (all activations time-major: (L, B_tile, channels))
# ----------------------------------------------------------------------------
def idecode_kernel(h_in_ref, x_in_ref, gamma_ref, beta_ref,
                   wih_f_ref, whh_f_ref, b_f_ref,
                   wih_b_ref, whh_b_ref, b_b_ref,
                   w0t_ref, w1t_ref, cb_ref,
                   h_out_ref, x_out_ref,
                   xn_s, hf_s, hb_s):
    L, Bt, C2 = xn_s.shape          # static
    H = C2 // 2
    cdt = xn_s.dtype                # matmul-operand dtype (f32 or bf16)
    eps = 1e-5

    # ---- LayerNorm over (L, 2H) per batch element (one-pass sum / sum-sq) ----
    x = x_in_ref[...].astype(jnp.float32)            # (L, Bt, 2H)
    sx = jnp.sum(x, axis=0)                          # (Bt, 2H)
    sx2 = jnp.sum(x * x, axis=0)                     # (Bt, 2H)
    inv_n = 1.0 / float(L * C2)
    mean = jnp.sum(sx, axis=-1, keepdims=True) * inv_n       # (Bt, 1)
    ex2 = jnp.sum(sx2, axis=-1, keepdims=True) * inv_n       # (Bt, 1)
    rstd = lax.rsqrt(ex2 - mean * mean + eps)                # (Bt, 1)
    xn = (x - mean) * rstd * gamma_ref[...] + beta_ref[...]  # (L, Bt, 2H)
    xn_s[...] = xn.astype(cdt)

    # ---- fused bidirectional LSTM (PyTorch gate order i, f, g, o) ----
    wih_f = wih_f_ref[...]; whh_f = whh_f_ref[...]; b_f = b_f_ref[...]
    wih_b = wih_b_ref[...]; whh_b = whh_b_ref[...]; b_b = b_b_ref[...]

    def gates_to_hc(g, c):
        i_g = jax.nn.sigmoid(g[:, 0:H])
        f_g = jax.nn.sigmoid(g[:, H:2 * H])
        g_g = jnp.tanh(g[:, 2 * H:3 * H])
        o_g = jax.nn.sigmoid(g[:, 3 * H:4 * H])
        c_new = f_g * c + i_g * g_g
        h_new = o_g * jnp.tanh(c_new)
        return h_new, c_new

    def lstm_step(t, carry):
        h_f, c_f, h_b, c_b = carry
        s = L - 1 - t
        # forward direction, time t
        g_f = (jnp.dot(xn_s[t], wih_f, preferred_element_type=jnp.float32)
               + jnp.dot(h_f.astype(cdt), whh_f, preferred_element_type=jnp.float32)
               + b_f)
        # backward direction, time L-1-t (interleaved for ILP)
        g_b = (jnp.dot(xn_s[s], wih_b, preferred_element_type=jnp.float32)
               + jnp.dot(h_b.astype(cdt), whh_b, preferred_element_type=jnp.float32)
               + b_b)
        h_f, c_f = gates_to_hc(g_f, c_f)
        h_b, c_b = gates_to_hc(g_b, c_b)
        hf_s[t] = h_f
        hb_s[s] = h_b
        return (h_f, c_f, h_b, c_b)

    zero = jnp.zeros((Bt, H), jnp.float32)
    lax.fori_loop(0, L, lstm_step, (zero, zero, zero, zero), unroll=True)

    # ---- concat(input_h, lstm_out) via lane-slice stores (no concatenate) ----
    h_out_ref[:, :, 0:C2] = h_in_ref[...].astype(h_out_ref.dtype)
    h_out_ref[:, :, C2:C2 + H] = hf_s[...].astype(h_out_ref.dtype)
    h_out_ref[:, :, C2 + H:4 * H] = hb_s[...].astype(h_out_ref.dtype)

    # ---- Conv1d(4H -> 2H, kernel=2, padding=1): two matmuls per output row,
    #      the w0-tap contribution is carried to the next row (no padded copies).
    w0 = w0t_ref[...]
    w1 = w1t_ref[...]
    cbias = cb_ref[...]

    def conv_step(l, p_prev):
        row = h_out_ref[l].astype(cdt)                      # (Bt, 4H)
        p1 = jnp.dot(row, w1, preferred_element_type=jnp.float32)
        x_out_ref[l] = (p_prev + p1 + cbias).astype(x_out_ref.dtype)
        return jnp.dot(row, w0, preferred_element_type=jnp.float32)

    p_last = lax.fori_loop(0, L, conv_step,
                           jnp.zeros((Bt, 2 * H), jnp.float32), unroll=True)
    x_out_ref[L] = (p_last + cbias).astype(x_out_ref.dtype)


# ----------------------------------------------------------------------------
# Wrapper for one InverseDecodingLayer
# ----------------------------------------------------------------------------
def idecode_layer(h_in, x_lbc, p, *, compute_dtype=jnp.float32, b_tile=None):
    """h_in: (B, L, 2H) batch-major; x_lbc: (L, B, 2H) time-major.
    Returns (h_lbc (L, B, 4H), x_out_lbc (L+1, B, 2H)), both time-major."""
    B, L, C2 = h_in.shape
    H = C2 // 2
    assert x_lbc.shape == (L, B, C2), (x_lbc.shape, (L, B, C2))

    # Batch tile: multiples of 8 fill the sublane dim; otherwise take full B.
    if b_tile is None:
        if B % 8 == 0:
            b_tile = 8
            while b_tile * 2 <= min(B, 64) and B % (b_tile * 2) == 0:
                b_tile *= 2
        else:
            b_tile = B
    if B % b_tile != 0 or (b_tile != B and b_tile % 8 != 0):
        b_tile = B
    grid = (B // b_tile,)

    cdt = compute_dtype
    h_lbc = jnp.transpose(h_in, (1, 0, 2))          # (L, B, 2H) time-major
    gamma = p["gamma"][:, None, :]                  # (L, 1, 2H)
    beta = p["beta"][:, None, :]

    out_shape = (jax.ShapeDtypeStruct((L, B, 4 * H), jnp.float32),
                 jax.ShapeDtypeStruct((L + 1, B, 2 * H), jnp.float32))

    grid_spec = pltpu.PrefetchScalarGridSpec(
        num_scalar_prefetch=0,
        grid=grid,
        in_specs=[
            pl.BlockSpec((L, b_tile, C2), lambda b: (0, b, 0)),       # h_in (time-major)
            pl.BlockSpec((L, b_tile, C2), lambda b: (0, b, 0)),       # x_in (time-major)
            pl.BlockSpec((L, 1, C2), lambda b: (0, 0, 0)),            # ln gamma
            pl.BlockSpec((L, 1, C2), lambda b: (0, 0, 0)),            # ln beta
            pl.BlockSpec((C2, 4 * H), lambda b: (0, 0)),              # W_ih fwd (T)
            pl.BlockSpec((H, 4 * H), lambda b: (0, 0)),               # W_hh fwd (T)
            pl.BlockSpec((1, 4 * H), lambda b: (0, 0)),               # b fwd
            pl.BlockSpec((C2, 4 * H), lambda b: (0, 0)),              # W_ih bwd (T)
            pl.BlockSpec((H, 4 * H), lambda b: (0, 0)),               # W_hh bwd (T)
            pl.BlockSpec((1, 4 * H), lambda b: (0, 0)),               # b bwd
            pl.BlockSpec((4 * H, 2 * H), lambda b: (0, 0)),           # conv W[:,:,0].T
            pl.BlockSpec((4 * H, 2 * H), lambda b: (0, 0)),           # conv W[:,:,1].T
            pl.BlockSpec((1, 2 * H), lambda b: (0, 0)),               # conv bias
        ],
        out_specs=[
            pl.BlockSpec((L, b_tile, 4 * H), lambda b: (0, b, 0)),
            pl.BlockSpec((L + 1, b_tile, 2 * H), lambda b: (0, b, 0)),
        ],
        scratch_shapes=[
            pltpu.VMEM((L, b_tile, C2), cdt),            # layer-normed x
            pltpu.VMEM((L, b_tile, H), jnp.float32),     # fwd LSTM hidden states
            pltpu.VMEM((L, b_tile, H), jnp.float32),     # bwd LSTM hidden states
        ],
    )

    return pl.pallas_call(
        idecode_kernel,
        out_shape=out_shape,
        grid_spec=grid_spec,
        compiler_params=pltpu.CompilerParams(
            dimension_semantics=("parallel",),   # independent batch tiles -> megacore
        ),
    )(h_lbc, x_lbc, gamma, beta,
      p["wih_f_T"].astype(cdt), p["whh_f_T"].astype(cdt), p["b_f"],
      p["wih_b_T"].astype(cdt), p["whh_b_T"].astype(cdt), p["b_b"],
      p["w0t"].astype(cdt), p["w1t"].astype(cdt), p["cb"])


# ----------------------------------------------------------------------------
# InversePyramidLayer forward (glue in plain JAX / Python)
# ----------------------------------------------------------------------------
def inverse_pyramid_forward(input_hs, params, seq_length, total_layers, hidden_size,
                            *, compute_dtype=jnp.float32):
    B = input_hs[-1].shape[0]
    L0 = seq_length - total_layers + 1
    # x flows between layers in time-major (L, B, 2H) layout (no per-layer transpose).
    x_lbc = jnp.zeros((L0, B, hidden_size * 2), jnp.float32)
    h = []
    for i in range(total_layers - 1, -1, -1):     # reverse_enumerate
        h_lbc, x_lbc = idecode_layer(input_hs[i], x_lbc, params[i],
                                     compute_dtype=compute_dtype)
        h.append(jnp.transpose(h_lbc, (1, 0, 2)))  # back to (B, L, 4H) for the user
    h.reverse()
    return h


# ----------------------------------------------------------------------------
# Pure-JAX reference (batch-major, for correctness checking)
# ----------------------------------------------------------------------------
def idecode_ref(h_in, x_in, p):
    B, L, C2 = x_in.shape
    H = C2 // 2
    mean = jnp.mean(x_in, axis=(1, 2), keepdims=True)
    var = jnp.mean((x_in - mean) ** 2, axis=(1, 2), keepdims=True)
    xn = (x_in - mean) * lax.rsqrt(var + 1e-5) * p["gamma"] + p["beta"]

    def lstm_dir(x, wih_T, whh_T, b, reverse):
        def step(carry, x_t):
            h, c = carry
            gates = x_t @ wih_T + h @ whh_T + b[0]
            i_g = jax.nn.sigmoid(gates[0:H]); f_g = jax.nn.sigmoid(gates[H:2 * H])
            g_g = jnp.tanh(gates[2 * H:3 * H]); o_g = jax.nn.sigmoid(gates[3 * H:4 * H])
            c = f_g * c + i_g * g_g
            h = o_g * jnp.tanh(c)
            return (h, c), h
        _, hs = lax.scan(step, (jnp.zeros(H), jnp.zeros(H)), x, reverse=reverse)
        return hs

    def one_batch(xn_b, h_b):
        hf = lstm_dir(xn_b, p["wih_f_T"], p["whh_f_T"], p["b_f"], False)
        hb = lstm_dir(xn_b, p["wih_b_T"], p["whh_b_T"], p["b_b"], True)
        h_cat = jnp.concatenate([h_b, hf, hb], axis=-1)
        xpad = jnp.pad(h_cat, ((1, 1), (0, 0)))
        y = xpad[:-1] @ p["w0t"] + xpad[1:] @ p["w1t"] + p["cb"]
        return h_cat, y

    return jax.vmap(one_batch)(xn, h_in)


def inverse_pyramid_ref(input_hs, params, seq_length, total_layers, hidden_size):
    B = input_hs[-1].shape[0]
    x = jnp.zeros((B, seq_length - total_layers + 1, hidden_size * 2), jnp.float32)
    h = []
    for i in range(total_layers - 1, -1, -1):
        h_l, x = idecode_ref(input_hs[i], x, params[i])
        h.append(h_l)
    h.reverse()
    return h


# ----------------------------------------------------------------------------
# Deterministic parameter init (shapes follow the PyTorch module's __init__)
# ----------------------------------------------------------------------------
def init_layer_params(key, L, H):
    ks = jax.random.split(key, 10)
    scale = 1.0 / np.sqrt(H)

    def u(k, shape):
        return jax.random.uniform(k, shape, jnp.float32, -scale, scale)

    wih_f = u(ks[0], (4 * H, 2 * H)); whh_f = u(ks[1], (4 * H, H))
    b_f = u(ks[2], (4 * H,)) + u(ks[3], (4 * H,))            # b_ih + b_hh
    wih_b = u(ks[4], (4 * H, 2 * H)); whh_b = u(ks[5], (4 * H, H))
    b_b = u(ks[6], (4 * H,)) + u(ks[7], (4 * H,))
    conv_w = u(ks[8], (2 * H, 4 * H, 2))                     # (out, in, k)
    conv_b = u(ks[9], (2 * H,))

    return dict(
        gamma=jnp.ones((L, 2 * H), jnp.float32),
        beta=jnp.zeros((L, 2 * H), jnp.float32),
        wih_f_T=wih_f.T, whh_f_T=whh_f.T, b_f=b_f[None, :],
        wih_b_T=wih_b.T, whh_b_T=whh_b.T, b_b=b_b[None, :],
        w0t=conv_w[:, :, 0].T, w1t=conv_w[:, :, 1].T, cb=conv_b[None, :],
    )


if __name__ == "__main__":
    B, H, SEQ, NLAYERS = 2, 8, 8, 4

    key = jax.random.PRNGKey(0)

    input_hs = []
    for i in range(NLAYERS):
        key, sub = jax.random.split(key)
        input_hs.append(jax.random.normal(sub, (B, SEQ - i, 2 * H), jnp.float32))

    params = []
    for i in range(NLAYERS):
        key, sub = jax.random.split(key)
        params.append(init_layer_params(sub, SEQ - i, H))

    # Pallas kernel pyramid (f32 matmul operands) vs pure-JAX reference
    h_pallas = jax.block_until_ready(
        inverse_pyramid_forward(input_hs, params, SEQ, NLAYERS, H))
    h_ref = jax.block_until_ready(
        inverse_pyramid_ref(input_hs, params, SEQ, NLAYERS, H))

    for i, (a, b) in enumerate(zip(h_pallas, h_ref)):
        assert a.shape == (B, SEQ - i, 4 * H), a.shape
        np.testing.assert_allclose(np.asarray(a), np.asarray(b),
                                   atol=3e-3, rtol=3e-3)

    # bf16 matmul-operand variant (v6e/v7x MXU path); elementwise math stays f32.
    h_bf16 = jax.block_until_ready(
        inverse_pyramid_forward(input_hs, params, SEQ, NLAYERS, H,
                                compute_dtype=jnp.bfloat16))
    for a, b in zip(h_bf16, h_ref):
        np.testing.assert_allclose(np.asarray(a), np.asarray(b),
                                   atol=1e-1, rtol=1e-1)

    print("KERNEL_OK")
</pallas_src>

<mosaic_0001>
module attributes {stable_mosaic.version = 11 : i64} {
  func.func @idecode_kernel(%arg0: i32, %arg1: memref<5x2x16xf32, #tpu.memory_space<vmem>>, %arg2: memref<5x2x16xf32, #tpu.memory_space<vmem>>, %arg3: memref<5x1x16xf32, #tpu.memory_space<vmem>>, %arg4: memref<5x1x16xf32, #tpu.memory_space<vmem>>, %arg5: memref<16x32xf32, #tpu.memory_space<vmem>>, %arg6: memref<8x32xf32, #tpu.memory_space<vmem>>, %arg7: memref<1x32xf32, #tpu.memory_space<vmem>>, %arg8: memref<16x32xf32, #tpu.memory_space<vmem>>, %arg9: memref<8x32xf32, #tpu.memory_space<vmem>>, %arg10: memref<1x32xf32, #tpu.memory_space<vmem>>, %arg11: memref<32x16xf32, #tpu.memory_space<vmem>>, %arg12: memref<32x16xf32, #tpu.memory_space<vmem>>, %arg13: memref<1x16xf32, #tpu.memory_space<vmem>>, %arg14: memref<5x2x32xf32, #tpu.memory_space<vmem>>, %arg15: memref<6x2x16xf32, #tpu.memory_space<vmem>>, %arg16: memref<5x2x16xf32, #tpu.memory_space<vmem>>, %arg17: memref<5x2x8xf32, #tpu.memory_space<vmem>>, %arg18: memref<5x2x8xf32, #tpu.memory_space<vmem>>) attributes {dimension_semantics = [#tpu.dimension_semantics<parallel>], iteration_bounds = array<i64: 1>, scalar_prefetch = 0 : i64, scratch_operands = 3 : i64, tpu.core_type = #tpu.core_type<tc>, window_params = [{transform_indices = @transform_0, window_bounds = array<i64: 5, 2, 16>}, {transform_indices = @transform_1, window_bounds = array<i64: 5, 2, 16>}, {pipeline_mode = #tpu.pipeline_mode<synchronous>, transform_indices = @transform_2, window_bounds = array<i64: 5, 1, 16>}, {pipeline_mode = #tpu.pipeline_mode<synchronous>, transform_indices = @transform_3, window_bounds = array<i64: 5, 1, 16>}, {pipeline_mode = #tpu.pipeline_mode<synchronous>, transform_indices = @transform_4, window_bounds = array<i64: 16, 32>}, {pipeline_mode = #tpu.pipeline_mode<synchronous>, transform_indices = @transform_5, window_bounds = array<i64: 8, 32>}, {pipeline_mode = #tpu.pipeline_mode<synchronous>, transform_indices = @transform_6, window_bounds = array<i64: 1, 32>}, {pipeline_mode = #tpu.pipeline_mode<synchronous>, transform_indices = @transform_7, window_bounds = array<i64: 16, 32>}, {pipeline_mode = #tpu.pipeline_mode<synchronous>, transform_indices = @transform_8, window_bounds = array<i64: 8, 32>}, {pipeline_mode = #tpu.pipeline_mode<synchronous>, transform_indices = @transform_9, window_bounds = array<i64: 1, 32>}, {pipeline_mode = #tpu.pipeline_mode<synchronous>, transform_indices = @transform_10, window_bounds = array<i64: 32, 16>}, {pipeline_mode = #tpu.pipeline_mode<synchronous>, transform_indices = @transform_11, window_bounds = array<i64: 32, 16>}, {pipeline_mode = #tpu.pipeline_mode<synchronous>, transform_indices = @transform_12, window_bounds = array<i64: 1, 16>}, {transform_indices = @transform_13, window_bounds = array<i64: 5, 2, 32>}, {transform_indices = @transform_14, window_bounds = array<i64: 6, 2, 16>}]} {
    %c0 = arith.constant 0 : index
    %c0_0 = arith.constant 0 : index
    %c0_1 = arith.constant 0 : index
    %0 = vector.load %arg2[%c0, %c0_0, %c0_1] : memref<5x2x16xf32, #tpu.memory_space<vmem>>, vector<5x2x16xf32>
    %cst = arith.constant dense<0.000000e+00> : vector<2x16xf32>
    %1 = vector.multi_reduction <add>, %0, %cst [0] : vector<5x2x16xf32> to vector<2x16xf32>
    %2 = arith.mulf %0, %0 : vector<5x2x16xf32>
    %cst_2 = arith.constant dense<0.000000e+00> : vector<2x16xf32>
    %3 = vector.multi_reduction <add>, %2, %cst_2 [0] : vector<5x2x16xf32> to vector<2x16xf32>
    %cst_3 = arith.constant dense<0.000000e+00> : vector<2xf32>
    %4 = vector.multi_reduction <add>, %1, %cst_3 [1] : vector<2x16xf32> to vector<2xf32>
    %5 = vector.shape_cast %4 : vector<2xf32> to vector<2x1xf32>
    %cst_4 = arith.constant 1.250000e-02 : f32
    %6 = vector.broadcast %cst_4 : f32 to vector<2x1xf32>
    %7 = arith.mulf %5, %6 : vector<2x1xf32>
    %cst_5 = arith.constant dense<0.000000e+00> : vector<2xf32>
    %8 = vector.multi_reduction <add>, %3, %cst_5 [1] : vector<2x16xf32> to vector<2xf32>
    %9 = vector.shape_cast %8 : vector<2xf32> to vector<2x1xf32>
    %cst_6 = arith.constant 1.250000e-02 : f32
    %10 = vector.broadcast %cst_6 : f32 to vector<2x1xf32>
    %11 = arith.mulf %9, %10 : vector<2x1xf32>
    %12 = arith.mulf %7, %7 : vector<2x1xf32>
    %13 = arith.subf %11, %12 : vector<2x1xf32>
    %cst_7 = arith.constant 9.99999974E-6 : f32
    %14 = vector.broadcast %cst_7 : f32 to vector<2x1xf32>
    %15 = arith.addf %13, %14 : vector<2x1xf32>
    %16 = math.rsqrt %15 : vector<2x1xf32>
    %17 = vector.shape_cast %7 : vector<2x1xf32> to vector<1x2x1xf32>
    %18 = vector.broadcast %17 : vector<1x2x1xf32> to vector<5x2x16xf32>
    %19 = arith.subf %0, %18 : vector<5x2x16xf32>
    %20 = vector.shape_cast %16 : vector<2x1xf32> to vector<1x2x1xf32>
    %21 = vector.broadcast %20 : vector<1x2x1xf32> to vector<5x2x16xf32>
    %22 = arith.mulf %19, %21 : vector<5x2x16xf32>
    %c0_8 = arith.constant 0 : index
    %c0_9 = arith.constant 0 : index
    %c0_10 = arith.constant 0 : index
    %23 = vector.load %arg3[%c0_8, %c0_9, %c0_10] : memref<5x1x16xf32, #tpu.memory_space<vmem>>, vector<5x1x16xf32>
    %24 = vector.broadcast %23 : vector<5x1x16xf32> to vector<5x2x16xf32>
    %25 = arith.mulf %22, %24 : vector<5x2x16xf32>
    %c0_11 = arith.constant 0 : index
    %c0_12 = arith.constant 0 : index
    %c0_13 = arith.constant 0 : index
    %26 = vector.load %arg4[%c0_11, %c0_12, %c0_13] : memref<5x1x16xf32, #tpu.memory_space<vmem>>, vector<5x1x16xf32>
    %27 = vector.broadcast %26 : vector<5x1x16xf32> to vector<5x2x16xf32>
    %28 = arith.addf %25, %27 : vector<5x2x16xf32>
    %c0_14 = arith.constant 0 : index
    %c0_15 = arith.constant 0 : index
    %c0_16 = arith.constant 0 : index
    %29 = vector.load %arg16[%c0_14, %c0_15, %c0_16] : memref<5x2x16xf32, #tpu.memory_space<vmem>>, vector<5x2x16xf32>
    tpu.vector_store %arg16[%c0_14, %c0_15, %c0_16], %28 {strides = array<i32>} : memref<5x2x16xf32, #tpu.memory_space<vmem>>, vector<5x2x16xf32>,
    %c0_17 = arith.constant 0 : index
    %c0_18 = arith.constant 0 : index
    %30 = vector.load %arg5[%c0_17, %c0_18] : memref<16x32xf32, #tpu.memory_space<vmem>>, vector<16x32xf32>
    %c0_19 = arith.constant 0 : index
    %c0_20 = arith.constant 0 : index
    %31 = vector.load %arg6[%c0_19, %c0_20] : memref<8x32xf32, #tpu.memory_space<vmem>>, vector<8x32xf32>
    %c0_21 = arith.constant 0 : index
    %c0_22 = arith.constant 0 : index
    %32 = vector.load %arg7[%c0_21, %c0_22] : memref<1x32xf32, #tpu.memory_space<vmem>>, vector<1x32xf32>
    %c0_23 = arith.constant 0 : index
    %c0_24 = arith.constant 0 : index
    %33 = vector.load %arg8[%c0_23, %c0_24] : memref<16x32xf32, #tpu.memory_space<vmem>>, vector<16x32xf32>
    %c0_25 = arith.constant 0 : index
    %c0_26 = arith.constant 0 : index
    %34 = vector.load %arg9[%c0_25, %c0_26] : memref<8x32xf32, #tpu.memory_space<vmem>>, vector<8x32xf32>
    %c0_27 = arith.constant 0 : index
    %c0_28 = arith.constant 0 : index
    %35 = vector.load %arg10[%c0_27, %c0_28] : memref<1x32xf32, #tpu.memory_space<vmem>>, vector<1x32xf32>
    %cst_29 = arith.constant 0.000000e+00 : f32
    %36 = vector.broadcast %cst_29 : f32 to vector<2x8xf32>
    %c0_i32 = arith.constant 0 : i32
    %c4_i32 = arith.constant 4 : i32
    %37 = arith.subi %c4_i32, %c0_i32 : i32
    %38 = arith.index_cast %c0_i32 : i32 to index
    %c0_30 = arith.constant 0 : index
    %c0_31 = arith.constant 0 : index
    %39 = vector.load %arg16[%38, %c0_30, %c0_31] : memref<5x2x16xf32, #tpu.memory_space<vmem>>, vector<1x2x16xf32>
    %40 = vector.shape_cast %39 : vector<1x2x16xf32> to vector<2x16xf32>
    %cst_32 = arith.constant dense<0.000000e+00> : vector<2x32xf32>
    %41 = tpu.matmul %40, %30, %cst_32 {dimension_numbers = #tpu.dot_dimension_numbers<[1], [0], [0], [1], [0, 0, 1, 1], [], []>} : vector<2x16xf32>, vector<16x32xf32>, vector<2x32xf32> -> vector<2x32xf32>
    %cst_33 = arith.constant dense<0.000000e+00> : vector<2x32xf32>
    %42 = tpu.matmul %36, %31, %cst_33 {dimension_numbers = #tpu.dot_dimension_numbers<[1], [0], [0], [1], [0, 0, 1, 1], [], []>} : vector<2x8xf32>, vector<8x32xf32>, vector<2x32xf32> -> vector<2x32xf32>
    %43 = arith.addf %41, %42 : vector<2x32xf32>
    %44 = vector.broadcast %32 : vector<1x32xf32> to vector<2x32xf32>
    %45 = arith.addf %43, %44 : vector<2x32xf32>
    %46 = arith.index_cast %37 : i32 to index
    %c0_34 = arith.constant 0 : index
    %c0_35 = arith.constant 0 : index
    %47 = vector.load %arg16[%46, %c0_34, %c0_35] : memref<5x2x16xf32, #tpu.memory_space<vmem>>, vector<1x2x16xf32>
    %48 = vector.shape_cast %47 : vector<1x2x16xf32> to vector<2x16xf32>
    %cst_36 = arith.constant dense<0.000000e+00> : vector<2x32xf32>
    %49 = tpu.matmul %48, %33, %cst_36 {dimension_numbers = #tpu.dot_dimension_numbers<[1], [0], [0], [1], [0, 0, 1, 1], [], []>} : vector<2x16xf32>, vector<16x32xf32>, vector<2x32xf32> -> vector<2x32xf32>
    %cst_37 = arith.constant dense<0.000000e+00> : vector<2x32xf32>
    %50 = tpu.matmul %36, %34, %cst_37 {dimension_numbers = #tpu.dot_dimension_numbers<[1], [0], [0], [1], [0, 0, 1, 1], [], []>} : vector<2x8xf32>, vector<8x32xf32>, vector<2x32xf32> -> vector<2x32xf32>
    %51 = arith.addf %49, %50 : vector<2x32xf32>
    %52 = vector.broadcast %35 : vector<1x32xf32> to vector<2x32xf32>
    %53 = arith.addf %51, %52 : vector<2x32xf32>
    %54 = vector.extract_strided_slice %45 {offsets = [0, 0], sizes = [2, 8], strides = [1, 1]} : vector<2x32xf32> to vector<2x8xf32>
    %55 = arith.negf %54 : vector<2x8xf32>
    %56 = math.exp %55 : vector<2x8xf32>
    %cst_38 = arith.constant 1.000000e+00 : f32
    %57 = vector.broadcast %cst_38 : f32 to vector<2x8xf32>
    %58 = arith.addf %57, %56 : vector<2x8xf32>
    %59 = arith.divf %57, %58 : vector<2x8xf32>
    %60 = vector.extract_strided_slice %45 {offsets = [0, 8], sizes = [2, 8], strides = [1, 1]} : vector<2x32xf32> to vector<2x8xf32>
    %61 = arith.negf %60 : vector<2x8xf32>
    %62 = math.exp %61 : vector<2x8xf32>
    %cst_39 = arith.constant 1.000000e+00 : f32
    %63 = vector.broadcast %cst_39 : f32 to vector<2x8xf32>
    %64 = arith.addf %63, %62 : vector<2x8xf32>
    %65 = arith.divf %63, %64 : vector<2x8xf32>
    %66 = vector.extract_strided_slice %45 {offsets = [0, 16], sizes = [2, 8], strides = [1, 1]} : vector<2x32xf32> to vector<2x8xf32>
    %67 = math.tanh %66 : vector<2x8xf32>
    %68 = vector.extract_strided_slice %45 {offsets = [0, 24], sizes = [2, 8], strides = [1, 1]} : vector<2x32xf32> to vector<2x8xf32>
    %69 = arith.negf %68 : vector<2x8xf32>
    %70 = math.exp %69 : vector<2x8xf32>
    %cst_40 = arith.constant 1.000000e+00 : f32
    %71 = vector.broadcast %cst_40 : f32 to vector<2x8xf32>
    %72 = arith.addf %71, %70 : vector<2x8xf32>
    %73 = arith.divf %71, %72 : vector<2x8xf32>
    %74 = arith.mulf %65, %36 : vector<2x8xf32>
    %75 = arith.mulf %59, %67 : vector<2x8xf32>
    %76 = arith.addf %74, %75 : vector<2x8xf32>
    %77 = math.tanh %76 : vector<2x8xf32>
    %78 = arith.mulf %73, %77 : vector<2x8xf32>
    %79 = vector.extract_strided_slice %53 {offsets = [0, 0], sizes = [2, 8], strides = [1, 1]} : vector<2x32xf32> to vector<2x8xf32>
    %80 = arith.negf %79 : vector<2x8xf32>
    %81 = math.exp %80 : vector<2x8xf32>
    %cst_41 = arith.constant 1.000000e+00 : f32
    %82 = vector.broadcast %cst_41 : f32 to vector<2x8xf32>
    %83 = arith.addf %82, %81 : vector<2x8xf32>
    %84 = arith.divf %82, %83 : vector<2x8xf32>
    %85 = vector.extract_strided_slice %53 {offsets = [0, 8], sizes = [2, 8], strides = [1, 1]} : vector<2x32xf32> to vector<2x8xf32>
    %86 = arith.negf %85 : vector<2x8xf32>
    %87 = math.exp %86 : vector<2x8xf32>
    %cst_42 = arith.constant 1.000000e+00 : f32
    %88 = vector.broadcast %cst_42 : f32 to vector<2x8xf32>
    %89 = arith.addf %88, %87 : vector<2x8xf32>
    %90 = arith.divf %88, %89 : vector<2x8xf32>
    %91 = vector.extract_strided_slice %53 {offsets = [0, 16], sizes = [2, 8], strides = [1, 1]} : vector<2x32xf32> to vector<2x8xf32>
    %92 = math.tanh %91 : vector<2x8xf32>
    %93 = vector.extract_strided_slice %53 {offsets = [0, 24], sizes = [2, 8], strides = [1, 1]} : vector<2x32xf32> to vector<2x8xf32>
    %94 = arith.negf %93 : vector<2x8xf32>
    %95 = math.exp %94 : vector<2x8xf32>
    %cst_43 = arith.constant 1.000000e+00 : f32
    %96 = vector.broadcast %cst_43 : f32 to vector<2x8xf32>
    %97 = arith.addf %96, %95 : vector<2x8xf32>
    %98 = arith.divf %96, %97 : vector<2x8xf32>
    %99 = arith.mulf %90, %36 : vector<2x8xf32>
    %100 = arith.mulf %84, %92 : vector<2x8xf32>
    %101 = arith.addf %99, %100 : vector<2x8xf32>
    %102 = math.tanh %101 : vector<2x8xf32>
    %103 = arith.mulf %98, %102 : vector<2x8xf32>
    %104 = arith.index_cast %c0_i32 : i32 to index
    %c0_44 = arith.constant 0 : index
    %c0_45 = arith.constant 0 : index
    %105 = vector.load %arg17[%104, %c0_44, %c0_45] : memref<5x2x8xf32, #tpu.memory_space<vmem>>, vector<1x2x8xf32>
    %106 = vector.shape_cast %105 : vector<1x2x8xf32> to vector<2x8xf32>
    %107 = vector.shape_cast %78 : vector<2x8xf32> to vector<1x2x8xf32>
    tpu.vector_store %arg17[%104, %c0_44, %c0_45], %107 {strides = array<i32>} : memref<5x2x8xf32, #tpu.memory_space<vmem>>, vector<1x2x8xf32>,
    %108 = arith.index_cast %37 : i32 to index
    %c0_46 = arith.constant 0 : index
    %c0_47 = arith.constant 0 : index
    %109 = vector.load %arg18[%108, %c0_46, %c0_47] : memref<5x2x8xf32, #tpu.memory_space<vmem>>, vector<1x2x8xf32>
    %110 = vector.shape_cast %109 : vector<1x2x8xf32> to vector<2x8xf32>
    %111 = vector.shape_cast %103 : vector<2x8xf32> to vector<1x2x8xf32>
    tpu.vector_store %arg18[%108, %c0_46, %c0_47], %111 {strides = array<i32>} : memref<5x2x8xf32, #tpu.memory_space<vmem>>, vector<1x2x8xf32>,
    %c1_i32 = arith.constant 1 : i32
    %c4_i32_48 = arith.constant 4 : i32
    %112 = arith.subi %c4_i32_48, %c1_i32 : i32
    %113 = arith.index_cast %c1_i32 : i32 to index
    %c0_49 = arith.constant 0 : index
    %c0_50 = arith.constant 0 : index
    %114 = vector.load %arg16[%113, %c0_49, %c0_50] : memref<5x2x16xf32, #tpu.memory_space<vmem>>, vector<1x2x16xf32>
    %115 = vector.shape_cast %114 : vector<1x2x16xf32> to vector<2x16xf32>
    %cst_51 = arith.constant dense<0.000000e+00> : vector<2x32xf32>
    %116 = tpu.matmul %115, %30, %cst_51 {dimension_numbers = #tpu.dot_dimension_numbers<[1], [0], [0], [1], [0, 0, 1, 1], [], []>} : vector<2x16xf32>, vector<16x32xf32>, vector<2x32xf32> -> vector<2x32xf32>
    %cst_52 = arith.constant dense<0.000000e+00> : vector<2x32xf32>
    %117 = tpu.matmul %78, %31, %cst_52 {dimension_numbers = #tpu.dot_dimension_numbers<[1], [0], [0], [1], [0, 0, 1, 1], [], []>} : vector<2x8xf32>, vector<8x32xf32>, vector<2x32xf32> -> vector<2x32xf32>
    %118 = arith.addf %116, %117 : vector<2x32xf32>
    %119 = vector.broadcast %32 : vector<1x32xf32> to vector<2x32xf32>
    %120 = arith.addf %118, %119 : vector<2x32xf32>
    %121 = arith.index_cast %112 : i32 to index
    %c0_53 = arith.constant 0 : index
    %c0_54 = arith.constant 0 : index
    %122 = vector.load %arg16[%121, %c0_53, %c0_54] : memref<5x2x16xf32, #tpu.memory_space<vmem>>, vector<1x2x16xf32>
    %123 = vector.shape_cast %122 : vector<1x2x16xf32> to vector<2x16xf32>
    %cst_55 = arith.constant dense<0.000000e+00> : vector<2x32xf32>
    %124 = tpu.matmul %123, %33, %cst_55 {dimension_numbers = #tpu.dot_dimension_numbers<[1], [0], [0], [1], [0, 0, 1, 1], [], []>} : vector<2x16xf32>, vector<16x32xf32>, vector<2x32xf32> -> vector<2x32xf32>
    %cst_56 = arith.constant dense<0.000000e+00> : vector<2x32xf32>
    %125 = tpu.matmul %103, %34, %cst_56 {dimension_numbers = #tpu.dot_dimension_numbers<[1], [0], [0], [1], [0, 0, 1, 1], [], []>} : vector<2x8xf32>, vector<8x32xf32>, vector<2x32xf32> -> vector<2x32xf32>
    %126 = arith.addf %124, %125 : vector<2x32xf32>
    %127 = vector.broadcast %35 : vector<1x32xf32> to vector<2x32xf32>
    %128 = arith.addf %126, %127 : vector<2x32xf32>
    %129 = vector.extract_strided_slice %120 {offsets = [0, 0], sizes = [2, 8], strides = [1, 1]} : vector<2x32xf32> to vector<2x8xf32>
    %130 = arith.negf %129 : vector<2x8xf32>
    %131 = math.exp %130 : vector<2x8xf32>
    %cst_57 = arith.constant 1.000000e+00 : f32
    %132 = vector.broadcast %cst_57 : f32 to vector<2x8xf32>
    %133 = arith.addf %132, %131 : vector<2x8xf32>
    %134 = arith.divf %132, %133 : vector<2x8xf32>
    %135 = vector.extract_strided_slice %120 {offsets = [0, 8], sizes = [2, 8], strides = [1, 1]} : vector<2x32xf32> to vector<2x8xf32>
    %136 = arith.negf %135 : vector<2x8xf32>
    %137 = math.exp %136 : vector<2x8xf32>
    %cst_58 = arith.constant 1.000000e+00 : f32
    %138 = vector.broadcast %cst_58 : f32 to vector<2x8xf32>
    %139 = arith.addf %138, %137 : vector<2x8xf32>
    %140 = arith.divf %138, %139 : vector<2x8xf32>
    %141 = vector.extract_strided_slice %120 {offsets = [0, 16], sizes = [2, 8], strides = [1, 1]} : vector<2x32xf32> to vector<2x8xf32>
    %142 = math.tanh %141 : vector<2x8xf32>
    %143 = vector.extract_strided_slice %120 {offsets = [0, 24], sizes = [2, 8], strides = [1, 1]} : vector<2x32xf32> to vector<2x8xf32>
    %144 = arith.negf %143 : vector<2x8xf32>
    %145 = math.exp %144 : vector<2x8xf32>
    %cst_59 = arith.constant 1.000000e+00 : f32
    %146 = vector.broadcast %cst_59 : f32 to vector<2x8xf32>
    %147 = arith.addf %146, %145 : vector<2x8xf32>
    %148 = arith.divf %146, %147 : vector<2x8xf32>
    %149 = arith.mulf %140, %76 : vector<2x8xf32>
    %150 = arith.mulf %134, %142 : vector<2x8xf32>
    %151 = arith.addf %149, %150 : vector<2x8xf32>
    %152 = math.tanh %151 : vector<2x8xf32>
    %153 = arith.mulf %148, %152 : vector<2x8xf32>
    %154 = vector.extract_strided_slice %128 {offsets = [0, 0], sizes = [2, 8], strides = [1, 1]} : vector<2x32xf32> to vector<2x8xf32>
    %155 = arith.negf %154 : vector<2x8xf32>
    %156 = math.exp %155 : vector<2x8xf32>
    %cst_60 = arith.constant 1.000000e+00 : f32
    %157 = vector.broadcast %cst_60 : f32 to vector<2x8xf32>
    %158 = arith.addf %157, %156 : vector<2x8xf32>
    %159 = arith.divf %157, %158 : vector<2x8xf32>
    %160 = vector.extract_strided_slice %128 {offsets = [0, 8], sizes = [2, 8], strides = [1, 1]} : vector<2x32xf32> to vector<2x8xf32>
    %161 = arith.negf %160 : vector<2x8xf32>
    %162 = math.exp %161 : vector<2x8xf32>
    %cst_61 = arith.constant 1.000000e+00 : f32
    %163 = vector.broadcast %cst_61 : f32 to vector<2x8xf32>
    %164 = arith.addf %163, %162 : vector<2x8xf32>
    %165 = arith.divf %163, %164 : vector<2x8xf32>
    %166 = vector.extract_strided_slice %128 {offsets = [0, 16], sizes = [2, 8], strides = [1, 1]} : vector<2x32xf32> to vector<2x8xf32>
    %167 = math.tanh %166 : vector<2x8xf32>
    %168 = vector.extract_strided_slice %128 {offsets = [0, 24], sizes = [2, 8], strides = [1, 1]} : vector<2x32xf32> to vector<2x8xf32>
    %169 = arith.negf %168 : vector<2x8xf32>
    %170 = math.exp %169 : vector<2x8xf32>
    %cst_62 = arith.constant 1.000000e+00 : f32
    %171 = vector.broadcast %cst_62 : f32 to vector<2x8xf32>
    %172 = arith.addf %171, %170 : vector<2x8xf32>
    %173 = arith.divf %171, %172 : vector<2x8xf32>
    %174 = arith.mulf %165, %101 : vector<2x8xf32>
    %175 = arith.mulf %159, %167 : vector<2x8xf32>
    %176 = arith.addf %174, %175 : vector<2x8xf32>
    %177 = math.tanh %176 : vector<2x8xf32>
    %178 = arith.mulf %173, %177 : vector<2x8xf32>
    %179 = arith.index_cast %c1_i32 : i32 to index
    %c0_63 = arith.constant 0 : index
    %c0_64 = arith.constant 0 : index
    %180 = vector.load %arg17[%179, %c0_63, %c0_64] : memref<5x2x8xf32, #tpu.memory_space<vmem>>, vector<1x2x8xf32>
    %181 = vector.shape_cast %180 : vector<1x2x8xf32> to vector<2x8xf32>
    %182 = vector.shape_cast %153 : vector<2x8xf32> to vector<1x2x8xf32>
    tpu.vector_store %arg17[%179, %c0_63, %c0_64], %182 {strides = array<i32>} : memref<5x2x8xf32, #tpu.memory_space<vmem>>, vector<1x2x8xf32>,
    %183 = arith.index_cast %112 : i32 to index
    %c0_65 = arith.constant 0 : index
    %c0_66 = arith.constant 0 : index
    %184 = vector.load %arg18[%183, %c0_65, %c0_66] : memref<5x2x8xf32, #tpu.memory_space<vmem>>, vector<1x2x8xf32>
    %185 = vector.shape_cast %184 : vector<1x2x8xf32> to vector<2x8xf32>
    %186 = vector.shape_cast %178 : vector<2x8xf32> to vector<1x2x8xf32>
    tpu.vector_store %arg18[%183, %c0_65, %c0_66], %186 {strides = array<i32>} : memref<5x2x8xf32, #tpu.memory_space<vmem>>, vector<1x2x8xf32>,
    %c2_i32 = arith.constant 2 : i32
    %c4_i32_67 = arith.constant 4 : i32
    %187 = arith.subi %c4_i32_67, %c2_i32 : i32
    %188 = arith.index_cast %c2_i32 : i32 to index
    %c0_68 = arith.constant 0 : index
    %c0_69 = arith.constant 0 : index
    %189 = vector.load %arg16[%188, %c0_68, %c0_69] : memref<5x2x16xf32, #tpu.memory_space<vmem>>, vector<1x2x16xf32>
    %190 = vector.shape_cast %189 : vector<1x2x16xf32> to vector<2x16xf32>
    %cst_70 = arith.constant dense<0.000000e+00> : vector<2x32xf32>
    %191 = tpu.matmul %190, %30, %cst_70 {dimension_numbers = #tpu.dot_dimension_numbers<[1], [0], [0], [1], [0, 0, 1, 1], [], []>} : vector<2x16xf32>, vector<16x32xf32>, vector<2x32xf32> -> vector<2x32xf32>
    %cst_71 = arith.constant dense<0.000000e+00> : vector<2x32xf32>
    %192 = tpu.matmul %153, %31, %cst_71 {dimension_numbers = #tpu.dot_dimension_numbers<[1], [0], [0], [1], [0, 0, 1, 1], [], []>} : vector<2x8xf32>, vector<8x32xf32>, vector<2x32xf32> -> vector<2x32xf32>
    %193 = arith.addf %191, %192 : vector<2x32xf32>
    %194 = vector.broadcast %32 : vector<1x32xf32> to vector<2x32xf32>
    %195 = arith.addf %193, %194 : vector<2x32xf32>
    %196 = arith.index_cast %187 : i32 to index
    %c0_72 = arith.constant 0 : index
    %c0_73 = arith.constant 0 : index
    %197 = vector.load %arg16[%196, %c0_72, %c0_73] : memref<5x2x16xf32, #tpu.memory_space<vmem>>, vector<1x2x16xf32>
    %198 = vector.shape_cast %197 : vector<1x2x16xf32> to vector<2x16xf32>
    %cst_74 = arith.constant dense<0.000000e+00> : vector<2x32xf32>
    %199 = tpu.matmul %198, %33, %cst_74 {dimension_numbers = #tpu.dot_dimension_numbers<[1], [0], [0], [1], [0, 0, 1, 1], [], []>} : vector<2x16xf32>, vector<16x32xf32>, vector<2x32xf32> -> vector<2x32xf32>
    %cst_75 = arith.constant dense<0.000000e+00> : vector<2x32xf32>
    %200 = tpu.matmul %178, %34, %cst_75 {dimension_numbers = #tpu.dot_dimension_numbers<[1], [0], [0], [1], [0, 0, 1, 1], [], []>} : vector<2x8xf32>, vector<8x32xf32>, vector<2x32xf32> -> vector<2x32xf32>
    %201 = arith.addf %199, %200 : vector<2x32xf32>
    %202 = vector.broadcast %35 : vector<1x32xf32> to vector<2x32xf32>
    %203 = arith.addf %201, %202 : vector<2x32xf32>
    %204 = vector.extract_strided_slice %195 {offsets = [0, 0], sizes = [2, 8], strides = [1, 1]} : vector<2x32xf32> to vector<2x8xf32>
    %205 = arith.negf %204 : vector<2x8xf32>
    %206 = math.exp %205 : vector<2x8xf32>
    %cst_76 = arith.constant 1.000000e+00 : f32
    %207 = vector.broadcast %cst_76 : f32 to vector<2x8xf32>
    %208 = arith.addf %207, %206 : vector<2x8xf32>
    %209 = arith.divf %207, %208 : vector<2x8xf32>
    %210 = vector.extract_strided_slice %195 {offsets = [0, 8], sizes = [2, 8], strides = [1, 1]} : vector<2x32xf32> to vector<2x8xf32>
    %211 = arith.negf %210 : vector<2x8xf32>
    %212 = math.exp %211 : vector<2x8xf32>
    %cst_77 = arith.constant 1.000000e+00 : f32
    %213 = vector.broadcast %cst_77 : f32 to vector<2x8xf32>
    %214 = arith.addf %213, %212 : vector<2x8xf32>
    %215 = arith.divf %213, %214 : vector<2x8xf32>
    %216 = vector.extract_strided_slice %195 {offsets = [0, 16], sizes = [2, 8], strides = [1, 1]} : vector<2x32xf32> to vector<2x8xf32>
    %217 = math.tanh %216 : vector<2x8xf32>
    %218 = vector.extract_strided_slice %195 {offsets = [0, 24], sizes = [2, 8], strides = [1, 1]} : vector<2x32xf32> to vector<2x8xf32>
    %219 = arith.negf %218 : vector<2x8xf32>
    %220 = math.exp %219 : vector<2x8xf32>
    %cst_78 = arith.constant 1.000000e+00 : f32
    %221 = vector.broadcast %cst_78 : f32 to vector<2x8xf32>
    %222 = arith.addf %221, %220 : vector<2x8xf32>
    %223 = arith.divf %221, %222 : vector<2x8xf32>
    %224 = arith.mulf %215, %151 : vector<2x8xf32>
    %225 = arith.mulf %209, %217 : vector<2x8xf32>
    %226 = arith.addf %224, %225 : vector<2x8xf32>
    %227 = math.tanh %226 : vector<2x8xf32>
    %228 = arith.mulf %223, %227 : vector<2x8xf32>
    %229 = vector.extract_strided_slice %203 {offsets = [0, 0], sizes = [2, 8], strides = [1, 1]} : vector<2x32xf32> to vector<2x8xf32>
    %230 = arith.negf %229 : vector<2x8xf32>
    %231 = math.exp %230 : vector<2x8xf32>
    %cst_79 = arith.constant 1.000000e+00 : f32
    %232 = vector.broadcast %cst_79 : f32 to vector<2x8xf32>
    %233 = arith.addf %232, %231 : vector<2x8xf32>
    %234 = arith.divf %232, %233 : vector<2x8xf32>
    %235 = vector.extract_strided_slice %203 {offsets = [0, 8], sizes = [2, 8], strides = [1, 1]} : vector<2x32xf32> to vector<2x8xf32>
    %236 = arith.negf %235 : vector<2x8xf32>
    %237 = math.exp %236 : vector<2x8xf32>
    %cst_80 = arith.constant 1.000000e+00 : f32
    %238 = vector.broadcast %cst_80 : f32 to vector<2x8xf32>
    %239 = arith.addf %238, %237 : vector<2x8xf32>
    %240 = arith.divf %238, %239 : vector<2x8xf32>
    %241 = vector.extract_strided_slice %203 {offsets = [0, 16], sizes = [2, 8], strides = [1, 1]} : vector<2x32xf32> to vector<2x8xf32>
    %242 = math.tanh %241 : vector<2x8xf32>
    %243 = vector.extract_strided_slice %203 {offsets = [0, 24], sizes = [2, 8], strides = [1, 1]} : vector<2x32xf32> to vector<2x8xf32>
    %244 = arith.negf %243 : vector<2x8xf32>
    %245 = math.exp %244 : vector<2x8xf32>
    %cst_81 = arith.constant 1.000000e+00 : f32
    %246 = vector.broadcast %cst_81 : f32 to vector<2x8xf32>
    %247 = arith.addf %246, %245 : vector<2x8xf32>
    %248 = arith.divf %246, %247 : vector<2x8xf32>
    %249 = arith.mulf %240, %176 : vector<2x8xf32>
    %250 = arith.mulf %234, %242 : vector<2x8xf32>
    %251 = arith.addf %249, %250 : vector<2x8xf32>
    %252 = math.tanh %251 : vector<2x8xf32>
    %253 = arith.mulf %248, %252 : vector<2x8xf32>
    %254 = arith.index_cast %c2_i32 : i32 to index
    %c0_82 = arith.constant 0 : index
    %c0_83 = arith.constant 0 : index
    %255 = vector.load %arg17[%254, %c0_82, %c0_83] : memref<5x2x8xf32, #tpu.memory_space<vmem>>, vector<1x2x8xf32>
    %256 = vector.shape_cast %255 : vector<1x2x8xf32> to vector<2x8xf32>
    %257 = vector.shape_cast %228 : vector<2x8xf32> to vector<1x2x8xf32>
    tpu.vector_store %arg17[%254, %c0_82, %c0_83], %257 {strides = array<i32>} : memref<5x2x8xf32, #tpu.memory_space<vmem>>, vector<1x2x8xf32>,
    %258 = arith.index_cast %187 : i32 to index
    %c0_84 = arith.constant 0 : index
    %c0_85 = arith.constant 0 : index
    %259 = vector.load %arg18[%258, %c0_84, %c0_85] : memref<5x2x8xf32, #tpu.memory_space<vmem>>, vector<1x2x8xf32>
    %260 = vector.shape_cast %259 : vector<1x2x8xf32> to vector<2x8xf32>
    %261 = vector.shape_cast %253 : vector<2x8xf32> to vector<1x2x8xf32>
    tpu.vector_store %arg18[%258, %c0_84, %c0_85], %261 {strides = array<i32>} : memref<5x2x8xf32, #tpu.memory_space<vmem>>, vector<1x2x8xf32>,
    %c3_i32 = arith.constant 3 : i32
    %c4_i32_86 = arith.constant 4 : i32
    %262 = arith.subi %c4_i32_86, %c3_i32 : i32
    %263 = arith.index_cast %c3_i32 : i32 to index
    %c0_87 = arith.constant 0 : index
    %c0_88 = arith.constant 0 : index
    %264 = vector.load %arg16[%263, %c0_87, %c0_88] : memref<5x2x16xf32, #tpu.memory_space<vmem>>, vector<1x2x16xf32>
    %265 = vector.shape_cast %264 : vector<1x2x16xf32> to vector<2x16xf32>
    %cst_89 = arith.constant dense<0.000000e+00> : vector<2x32xf32>
    %266 = tpu.matmul %265, %30, %cst_89 {dimension_numbers = #tpu.dot_dimension_numbers<[1], [0], [0], [1], [0, 0, 1, 1], [], []>} : vector<2x16xf32>, vector<16x32xf32>, vector<2x32xf32> -> vector<2x32xf32>
    %cst_90 = arith.constant dense<0.000000e+00> : vector<2x32xf32>
    %267 = tpu.matmul %228, %31, %cst_90 {dimension_numbers = #tpu.dot_dimension_numbers<[1], [0], [0], [1], [0, 0, 1, 1], [], []>} : vector<2x8xf32>, vector<8x32xf32>, vector<2x32xf32> -> vector<2x32xf32>
    %268 = arith.addf %266, %267 : vector<2x32xf32>
    %269 = vector.broadcast %32 : vector<1x32xf32> to vector<2x32xf32>
    %270 = arith.addf %268, %269 : vector<2x32xf32>
    %271 = arith.index_cast %262 : i32 to index
    %c0_91 = arith.constant 0 : index
    %c0_92 = arith.constant 0 : index
    %272 = vector.load %arg16[%271, %c0_91, %c0_92] : memref<5x2x16xf32, #tpu.memory_space<vmem>>, vector<1x2x16xf32>
    %273 = vector.shape_cast %272 : vector<1x2x16xf32> to vector<2x16xf32>
    %cst_93 = arith.constant dense<0.000000e+00> : vector<2x32xf32>
    %274 = tpu.matmul %273, %33, %cst_93 {dimension_numbers = #tpu.dot_dimension_numbers<[1], [0], [0], [1], [0, 0, 1, 1], [], []>} : vector<2x16xf32>, vector<16x32xf32>, vector<2x32xf32> -> vector<2x32xf32>
    %cst_94 = arith.constant dense<0.000000e+00> : vector<2x32xf32>
    %275 = tpu.matmul %253, %34, %cst_94 {dimension_numbers = #tpu.dot_dimension_numbers<[1], [0], [0], [1], [0, 0, 1, 1], [], []>} : vector<2x8xf32>, vector<8x32xf32>, vector<2x32xf32> -> vector<2x32xf32>
    %276 = arith.addf %274, %275 : vector<2x32xf32>
    %277 = vector.broadcast %35 : vector<1x32xf32> to vector<2x32xf32>
    %278 = arith.addf %276, %277 : vector<2x32xf32>
    %279 = vector.extract_strided_slice %270 {offsets = [0, 0], sizes = [2, 8], strides = [1, 1]} : vector<2x32xf32> to vector<2x8xf32>
    %280 = arith.negf %279 : vector<2x8xf32>
    %281 = math.exp %280 : vector<2x8xf32>
    %cst_95 = arith.constant 1.000000e+00 : f32
    %282 = vector.broadcast %cst_95 : f32 to vector<2x8xf32>
    %283 = arith.addf %282, %281 : vector<2x8xf32>
    %284 = arith.divf %282, %283 : vector<2x8xf32>
    %285 = vector.extract_strided_slice %270 {offsets = [0, 8], sizes = [2, 8], strides = [1, 1]} : vector<2x32xf32> to vector<2x8xf32>
    %286 = arith.negf %285 : vector<2x8xf32>
    %287 = math.exp %286 : vector<2x8xf32>
    %cst_96 = arith.constant 1.000000e+00 : f32
    %288 = vector.broadcast %cst_96 : f32 to vector<2x8xf32>
    %289 = arith.addf %288, %287 : vector<2x8xf32>
    %290 = arith.divf %288, %289 : vector<2x8xf32>
    %291 = vector.extract_strided_slice %270 {offsets = [0, 16], sizes = [2, 8], strides = [1, 1]} : vector<2x32xf32> to vector<2x8xf32>
    %292 = math.tanh %291 : vector<2x8xf32>
    %293 = vector.extract_strided_slice %270 {offsets = [0, 24], sizes = [2, 8], strides = [1, 1]} : vector<2x32xf32> to vector<2x8xf32>
    %294 = arith.negf %293 : vector<2x8xf32>
    %295 = math.exp %294 : vector<2x8xf32>
    %cst_97 = arith.constant 1.000000e+00 : f32
    %296 = vector.broadcast %cst_97 : f32 to vector<2x8xf32>
    %297 = arith.addf %296, %295 : vector<2x8xf32>
    %298 = arith.divf %296, %297 : vector<2x8xf32>
    %299 = arith.mulf %290, %226 : vector<2x8xf32>
    %300 = arith.mulf %284, %292 : vector<2x8xf32>
    %301 = arith.addf %299, %300 : vector<2x8xf32>
    %302 = math.tanh %301 : vector<2x8xf32>
    %303 = arith.mulf %298, %302 : vector<2x8xf32>
    %304 = vector.extract_strided_slice %278 {offsets = [0, 0], sizes = [2, 8], strides = [1, 1]} : vector<2x32xf32> to vector<2x8xf32>
    %305 = arith.negf %304 : vector<2x8xf32>
    %306 = math.exp %305 : vector<2x8xf32>
    %cst_98 = arith.constant 1.000000e+00 : f32
    %307 = vector.broadcast %cst_98 : f32 to vector<2x8xf32>
    %308 = arith.addf %307, %306 : vector<2x8xf32>
    %309 = arith.divf %307, %308 : vector<2x8xf32>
    %310 = vector.extract_strided_slice %278 {offsets = [0, 8], sizes = [2, 8], strides = [1, 1]} : vector<2x32xf32> to vector<2x8xf32>
    %311 = arith.negf %310 : vector<2x8xf32>
    %312 = math.exp %311 : vector<2x8xf32>
    %cst_99 = arith.constant 1.000000e+00 : f32
    %313 = vector.broadcast %cst_99 : f32 to vector<2x8xf32>
    %314 = arith.addf %313, %312 : vector<2x8xf32>
    %315 = arith.divf %313, %314 : vector<2x8xf32>
    %316 = vector.extract_strided_slice %278 {offsets = [0, 16], sizes = [2, 8], strides = [1, 1]} : vector<2x32xf32> to vector<2x8xf32>
    %317 = math.tanh %316 : vector<2x8xf32>
    %318 = vector.extract_strided_slice %278 {offsets = [0, 24], sizes = [2, 8], strides = [1, 1]} : vector<2x32xf32> to vector<2x8xf32>
    %319 = arith.negf %318 : vector<2x8xf32>
    %320 = math.exp %319 : vector<2x8xf32>
    %cst_100 = arith.constant 1.000000e+00 : f32
    %321 = vector.broadcast %cst_100 : f32 to vector<2x8xf32>
    %322 = arith.addf %321, %320 : vector<2x8xf32>
    %323 = arith.divf %321, %322 : vector<2x8xf32>
    %324 = arith.mulf %315, %251 : vector<2x8xf32>
    %325 = arith.mulf %309, %317 : vector<2x8xf32>
    %326 = arith.addf %324, %325 : vector<2x8xf32>
    %327 = math.tanh %326 : vector<2x8xf32>
    %328 = arith.mulf %323, %327 : vector<2x8xf32>
    %329 = arith.index_cast %c3_i32 : i32 to index
    %c0_101 = arith.constant 0 : index
    %c0_102 = arith.constant 0 : index
    %330 = vector.load %arg17[%329, %c0_101, %c0_102] : memref<5x2x8xf32, #tpu.memory_space<vmem>>, vector<1x2x8xf32>
    %331 = vector.shape_cast %330 : vector<1x2x8xf32> to vector<2x8xf32>
    %332 = vector.shape_cast %303 : vector<2x8xf32> to vector<1x2x8xf32>
    tpu.vector_store %arg17[%329, %c0_101, %c0_102], %332 {strides = array<i32>} : memref<5x2x8xf32, #tpu.memory_space<vmem>>, vector<1x2x8xf32>,
    %333 = arith.index_cast %262 : i32 to index
    %c0_103 = arith.constant 0 : index
    %c0_104 = arith.constant 0 : index
    %334 = vector.load %arg18[%333, %c0_103, %c0_104] : memref<5x2x8xf32, #tpu.memory_space<vmem>>, vector<1x2x8xf32>
    %335 = vector.shape_cast %334 : vector<1x2x8xf32> to vector<2x8xf32>
    %336 = vector.shape_cast %328 : vector<2x8xf32> to vector<1x2x8xf32>
    tpu.vector_store %arg18[%333, %c0_103, %c0_104], %336 {strides = array<i32>} : memref<5x2x8xf32, #tpu.memory_space<vmem>>, vector<1x2x8xf32>,
    %c4_i32_105 = arith.constant 4 : i32
    %c4_i32_106 = arith.constant 4 : i32
    %337 = arith.subi %c4_i32_106, %c4_i32_105 : i32
    %338 = arith.index_cast %c4_i32_105 : i32 to index
    %c0_107 = arith.constant 0 : index
    %c0_108 = arith.constant 0 : index
    %339 = vector.load %arg16[%338, %c0_107, %c0_108] : memref<5x2x16xf32, #tpu.memory_space<vmem>>, vector<1x2x16xf32>
    %340 = vector.shape_cast %339 : vector<1x2x16xf32> to vector<2x16xf32>
    %cst_109 = arith.constant dense<0.000000e+00> : vector<2x32xf32>
    %341 = tpu.matmul %340, %30, %cst_109 {dimension_numbers = #tpu.dot_dimension_numbers<[1], [0], [0], [1], [0, 0, 1, 1], [], []>} : vector<2x16xf32>, vector<16x32xf32>, vector<2x32xf32> -> vector<2x32xf32>
    %cst_110 = arith.constant dense<0.000000e+00> : vector<2x32xf32>
    %342 = tpu.matmul %303, %31, %cst_110 {dimension_numbers = #tpu.dot_dimension_numbers<[1], [0], [0], [1], [0, 0, 1, 1], [], []>} : vector<2x8xf32>, vector<8x32xf32>, vector<2x32xf32> -> vector<2x32xf32>
    %343 = arith.addf %341, %342 : vector<2x32xf32>
    %344 = vector.broadcast %32 : vector<1x32xf32> to vector<2x32xf32>
    %345 = arith.addf %343, %344 : vector<2x32xf32>
    %346 = arith.index_cast %337 : i32 to index
    %c0_111 = arith.constant 0 : index
    %c0_112 = arith.constant 0 : index
    %347 = vector.load %arg16[%346, %c0_111, %c0_112] : memref<5x2x16xf32, #tpu.memory_space<vmem>>, vector<1x2x16xf32>
    %348 = vector.shape_cast %347 : vector<1x2x16xf32> to vector<2x16xf32>
    %cst_113 = arith.constant dense<0.000000e+00> : vector<2x32xf32>
    %349 = tpu.matmul %348, %33, %cst_113 {dimension_numbers = #tpu.dot_dimension_numbers<[1], [0], [0], [1], [0, 0, 1, 1], [], []>} : vector<2x16xf32>, vector<16x32xf32>, vector<2x32xf32> -> vector<2x32xf32>
    %cst_114 = arith.constant dense<0.000000e+00> : vector<2x32xf32>
    %350 = tpu.matmul %328, %34, %cst_114 {dimension_numbers = #tpu.dot_dimension_numbers<[1], [0], [0], [1], [0, 0, 1, 1], [], []>} : vector<2x8xf32>, vector<8x32xf32>, vector<2x32xf32> -> vector<2x32xf32>
    %351 = arith.addf %349, %350 : vector<2x32xf32>
    %352 = vector.broadcast %35 : vector<1x32xf32> to vector<2x32xf32>
    %353 = arith.addf %351, %352 : vector<2x32xf32>
    %354 = vector.extract_strided_slice %345 {offsets = [0, 0], sizes = [2, 8], strides = [1, 1]} : vector<2x32xf32> to vector<2x8xf32>
    %355 = arith.negf %354 : vector<2x8xf32>
    %356 = math.exp %355 : vector<2x8xf32>
    %cst_115 = arith.constant 1.000000e+00 : f32
    %357 = vector.broadcast %cst_115 : f32 to vector<2x8xf32>
    %358 = arith.addf %357, %356 : vector<2x8xf32>
    %359 = arith.divf %357, %358 : vector<2x8xf32>
    %360 = vector.extract_strided_slice %345 {offsets = [0, 8], sizes = [2, 8], strides = [1, 1]} : vector<2x32xf32> to vector<2x8xf32>
    %361 = arith.negf %360 : vector<2x8xf32>
    %362 = math.exp %361 : vector<2x8xf32>
    %cst_116 = arith.constant 1.000000e+00 : f32
    %363 = vector.broadcast %cst_116 : f32 to vector<2x8xf32>
    %364 = arith.addf %363, %362 : vector<2x8xf32>
    %365 = arith.divf %363, %364 : vector<2x8xf32>
    %366 = vector.extract_strided_slice %345 {offsets = [0, 16], sizes = [2, 8], strides = [1, 1]} : vector<2x32xf32> to vector<2x8xf32>
    %367 = math.tanh %366 : vector<2x8xf32>
    %368 = vector.extract_strided_slice %345 {offsets = [0, 24], sizes = [2, 8], strides = [1, 1]} : vector<2x32xf32> to vector<2x8xf32>
    %369 = arith.negf %368 : vector<2x8xf32>
    %370 = math.exp %369 : vector<2x8xf32>
    %cst_117 = arith.constant 1.000000e+00 : f32
    %371 = vector.broadcast %cst_117 : f32 to vector<2x8xf32>
    %372 = arith.addf %371, %370 : vector<2x8xf32>
    %373 = arith.divf %371, %372 : vector<2x8xf32>
    %374 = arith.mulf %365, %301 : vector<2x8xf32>
    %375 = arith.mulf %359, %367 : vector<2x8xf32>
    %376 = arith.addf %374, %375 : vector<2x8xf32>
    %377 = math.tanh %376 : vector<2x8xf32>
    %378 = arith.mulf %373, %377 : vector<2x8xf32>
    %379 = vector.extract_strided_slice %353 {offsets = [0, 0], sizes = [2, 8], strides = [1, 1]} : vector<2x32xf32> to vector<2x8xf32>
    %380 = arith.negf %379 : vector<2x8xf32>
    %381 = math.exp %380 : vector<2x8xf32>
    %cst_118 = arith.constant 1.000000e+00 : f32
    %382 = vector.broadcast %cst_118 : f32 to vector<2x8xf32>
    %383 = arith.addf %382, %381 : vector<2x8xf32>
    %384 = arith.divf %382, %383 : vector<2x8xf32>
    %385 = vector.extract_strided_slice %353 {offsets = [0, 8], sizes = [2, 8], strides = [1, 1]} : vector<2x32xf32> to vector<2x8xf32>
    %386 = arith.negf %385 : vector<2x8xf32>
    %387 = math.exp %386 : vector<2x8xf32>
    %cst_119 = arith.constant 1.000000e+00 : f32
    %388 = vector.broadcast %cst_119 : f32 to vector<2x8xf32>
    %389 = arith.addf %388, %387 : vector<2x8xf32>
    %390 = arith.divf %388, %389 : vector<2x8xf32>
    %391 = vector.extract_strided_slice %353 {offsets = [0, 16], sizes = [2, 8], strides = [1, 1]} : vector<2x32xf32> to vector<2x8xf32>
    %392 = math.tanh %391 : vector<2x8xf32>
    %393 = vector.extract_strided_slice %353 {offsets = [0, 24], sizes = [2, 8], strides = [1, 1]} : vector<2x32xf32> to vector<2x8xf32>
    %394 = arith.negf %393 : vector<2x8xf32>
    %395 = math.exp %394 : vector<2x8xf32>
    %cst_120 = arith.constant 1.000000e+00 : f32
    %396 = vector.broadcast %cst_120 : f32 to vector<2x8xf32>
    %397 = arith.addf %396, %395 : vector<2x8xf32>
    %398 = arith.divf %396, %397 : vector<2x8xf32>
    %399 = arith.mulf %390, %326 : vector<2x8xf32>
    %400 = arith.mulf %384, %392 : vector<2x8xf32>
    %401 = arith.addf %399, %400 : vector<2x8xf32>
    %402 = math.tanh %401 : vector<2x8xf32>
    %403 = arith.mulf %398, %402 : vector<2x8xf32>
    %404 = arith.index_cast %c4_i32_105 : i32 to index
    %c0_121 = arith.constant 0 : index
    %c0_122 = arith.constant 0 : index
    %405 = vector.load %arg17[%404, %c0_121, %c0_122] : memref<5x2x8xf32, #tpu.memory_space<vmem>>, vector<1x2x8xf32>
    %406 = vector.shape_cast %405 : vector<1x2x8xf32> to vector<2x8xf32>
    %407 = vector.shape_cast %378 : vector<2x8xf32> to vector<1x2x8xf32>
    tpu.vector_store %arg17[%404, %c0_121, %c0_122], %407 {strides = array<i32>} : memref<5x2x8xf32, #tpu.memory_space<vmem>>, vector<1x2x8xf32>,
    %408 = arith.index_cast %337 : i32 to index
    %c0_123 = arith.constant 0 : index
    %c0_124 = arith.constant 0 : index
    %409 = vector.load %arg18[%408, %c0_123, %c0_124] : memref<5x2x8xf32, #tpu.memory_space<vmem>>, vector<1x2x8xf32>
    %410 = vector.shape_cast %409 : vector<1x2x8xf32> to vector<2x8xf32>
    %411 = vector.shape_cast %403 : vector<2x8xf32> to vector<1x2x8xf32>
    tpu.vector_store %arg18[%408, %c0_123, %c0_124], %411 {strides = array<i32>} : memref<5x2x8xf32, #tpu.memory_space<vmem>>, vector<1x2x8xf32>,
    %c5_i32 = arith.constant 5 : i32
    %c0_125 = arith.constant 0 : index
    %c0_126 = arith.constant 0 : index
    %c0_127 = arith.constant 0 : index
    %412 = vector.load %arg1[%c0_125, %c0_126, %c0_127] : memref<5x2x16xf32, #tpu.memory_space<vmem>>, vector<5x2x16xf32>
    %c0_128 = arith.constant 0 : index
    %c0_129 = arith.constant 0 : index
    %c0_130 = arith.constant 0 : index
    %413 = vector.load %arg14[%c0_128, %c0_129, %c0_130] : memref<5x2x32xf32, #tpu.memory_space<vmem>>, vector<5x2x16xf32>
    tpu.vector_store %arg14[%c0_128, %c0_129, %c0_130], %412 {strides = array<i32>} : memref<5x2x32xf32, #tpu.memory_space<vmem>>, vector<5x2x16xf32>,
    %c0_131 = arith.constant 0 : index
    %c0_132 = arith.constant 0 : index
    %c0_133 = arith.constant 0 : index
    %414 = vector.load %arg17[%c0_131, %c0_132, %c0_133] : memref<5x2x8xf32, #tpu.memory_space<vmem>>, vector<5x2x8xf32>
    %c0_134 = arith.constant 0 : index
    %c0_135 = arith.constant 0 : index
    %c16 = arith.constant 16 : index
    %415 = vector.load %arg14[%c0_134, %c0_135, %c16] : memref<5x2x32xf32, #tpu.memory_space<vmem>>, vector<5x2x8xf32>
    tpu.vector_store %arg14[%c0_134, %c0_135, %c16], %414 {strides = array<i32>} : memref<5x2x32xf32, #tpu.memory_space<vmem>>, vector<5x2x8xf32>,
    %c0_136 = arith.constant 0 : index
    %c0_137 = arith.constant 0 : index
    %c0_138 = arith.constant 0 : index
    %416 = vector.load %arg18[%c0_136, %c0_137, %c0_138] : memref<5x2x8xf32, #tpu.memory_space<vmem>>, vector<5x2x8xf32>
    %c0_139 = arith.constant 0 : index
    %c0_140 = arith.constant 0 : index
    %c24 = arith.constant 24 : index
    %417 = vector.load %arg14[%c0_139, %c0_140, %c24] : memref<5x2x32xf32, #tpu.memory_space<vmem>>, vector<5x2x8xf32>
    tpu.vector_store %arg14[%c0_139, %c0_140, %c24], %416 {strides = array<i32>} : memref<5x2x32xf32, #tpu.memory_space<vmem>>, vector<5x2x8xf32>,
    %c0_141 = arith.constant 0 : index
    %c0_142 = arith.constant 0 : index
    %418 = vector.load %arg11[%c0_141, %c0_142] : memref<32x16xf32, #tpu.memory_space<vmem>>, vector<32x16xf32>
    %c0_143 = arith.constant 0 : index
    %c0_144 = arith.constant 0 : index
    %419 = vector.load %arg12[%c0_143, %c0_144] : memref<32x16xf32, #tpu.memory_space<vmem>>, vector<32x16xf32>
    %c0_145 = arith.constant 0 : index
    %c0_146 = arith.constant 0 : index
    %420 = vector.load %arg13[%c0_145, %c0_146] : memref<1x16xf32, #tpu.memory_space<vmem>>, vector<1x16xf32>
    %cst_147 = arith.constant 0.000000e+00 : f32
    %421 = vector.broadcast %cst_147 : f32 to vector<2x16xf32>
    %c0_i32_148 = arith.constant 0 : i32
    %422 = arith.index_cast %c0_i32_148 : i32 to index
    %c0_149 = arith.constant 0 : index
    %c0_150 = arith.constant 0 : index
    %423 = vector.load %arg14[%422, %c0_149, %c0_150] : memref<5x2x32xf32, #tpu.memory_space<vmem>>, vector<1x2x32xf32>
    %424 = vector.shape_cast %423 : vector<1x2x32xf32> to vector<2x32xf32>
    %cst_151 = arith.constant dense<0.000000e+00> : vector<2x16xf32>
    %425 = tpu.matmul %424, %419, %cst_151 {dimension_numbers = #tpu.dot_dimension_numbers<[1], [0], [0], [1], [0, 0, 1, 1], [], []>} : vector<2x32xf32>, vector<32x16xf32>, vector<2x16xf32> -> vector<2x16xf32>
    %426 = arith.addf %421, %425 : vector<2x16xf32>
    %427 = vector.broadcast %420 : vector<1x16xf32> to vector<2x16xf32>
    %428 = arith.addf %426, %427 : vector<2x16xf32>
    %429 = arith.index_cast %c0_i32_148 : i32 to index
    %c0_152 = arith.constant 0 : index
    %c0_153 = arith.constant 0 : index
    %430 = vector.load %arg15[%429, %c0_152, %c0_153] : memref<6x2x16xf32, #tpu.memory_space<vmem>>, vector<1x2x16xf32>
    %431 = vector.shape_cast %430 : vector<1x2x16xf32> to vector<2x16xf32>
    %432 = vector.shape_cast %428 : vector<2x16xf32> to vector<1x2x16xf32>
    tpu.vector_store %arg15[%429, %c0_152, %c0_153], %432 {strides = array<i32>} : memref<6x2x16xf32, #tpu.memory_space<vmem>>, vector<1x2x16xf32>,
    %cst_154 = arith.constant dense<0.000000e+00> : vector<2x16xf32>
    %433 = tpu.matmul %424, %418, %cst_154 {dimension_numbers = #tpu.dot_dimension_numbers<[1], [0], [0], [1], [0, 0, 1, 1], [], []>} : vector<2x32xf32>, vector<32x16xf32>, vector<2x16xf32> -> vector<2x16xf32>
    %c1_i32_155 = arith.constant 1 : i32
    %434 = arith.index_cast %c1_i32_155 : i32 to index
    %c0_156 = arith.constant 0 : index
    %c0_157 = arith.constant 0 : index
    %435 = vector.load %arg14[%434, %c0_156, %c0_157] : memref<5x2x32xf32, #tpu.memory_space<vmem>>, vector<1x2x32xf32>
    %436 = vector.shape_cast %435 : vector<1x2x32xf32> to vector<2x32xf32>
    %cst_158 = arith.constant dense<0.000000e+00> : vector<2x16xf32>
    %437 = tpu.matmul %436, %419, %cst_158 {dimension_numbers = #tpu.dot_dimension_numbers<[1], [0], [0], [1], [0, 0, 1, 1], [], []>} : vector<2x32xf32>, vector<32x16xf32>, vector<2x16xf32> -> vector<2x16xf32>
    %438 = arith.addf %433, %437 : vector<2x16xf32>
    %439 = vector.broadcast %420 : vector<1x16xf32> to vector<2x16xf32>
    %440 = arith.addf %438, %439 : vector<2x16xf32>
    %441 = arith.index_cast %c1_i32_155 : i32 to index
    %c0_159 = arith.constant 0 : index
    %c0_160 = arith.constant 0 : index
    %442 = vector.load %arg15[%441, %c0_159, %c0_160] : memref<6x2x16xf32, #tpu.memory_space<vmem>>, vector<1x2x16xf32>
    %443 = vector.shape_cast %442 : vector<1x2x16xf32> to vector<2x16xf32>
    %444 = vector.shape_cast %440 : vector<2x16xf32> to vector<1x2x16xf32>
    tpu.vector_store %arg15[%441, %c0_159, %c0_160], %444 {strides = array<i32>} : memref<6x2x16xf32, #tpu.memory_space<vmem>>, vector<1x2x16xf32>,
    %cst_161 = arith.constant dense<0.000000e+00> : vector<2x16xf32>
    %445 = tpu.matmul %436, %418, %cst_161 {dimension_numbers = #tpu.dot_dimension_numbers<[1], [0], [0], [1], [0, 0, 1, 1], [], []>} : vector<2x32xf32>, vector<32x16xf32>, vector<2x16xf32> -> vector<2x16xf32>
    %c2_i32_162 = arith.constant 2 : i32
    %446 = arith.index_cast %c2_i32_162 : i32 to index
    %c0_163 = arith.constant 0 : index
    %c0_164 = arith.constant 0 : index
    %447 = vector.load %arg14[%446, %c0_163, %c0_164] : memref<5x2x32xf32, #tpu.memory_space<vmem>>, vector<1x2x32xf32>
    %448 = vector.shape_cast %447 : vector<1x2x32xf32> to vector<2x32xf32>
    %cst_165 = arith.constant dense<0.000000e+00> : vector<2x16xf32>
    %449 = tpu.matmul %448, %419, %cst_165 {dimension_numbers = #tpu.dot_dimension_numbers<[1], [0], [0], [1], [0, 0, 1, 1], [], []>} : vector<2x32xf32>, vector<32x16xf32>, vector<2x16xf32> -> vector<2x16xf32>
    %450 = arith.addf %445, %449 : vector<2x16xf32>
    %451 = vector.broadcast %420 : vector<1x16xf32> to vector<2x16xf32>
    %452 = arith.addf %450, %451 : vector<2x16xf32>
    %453 = arith.index_cast %c2_i32_162 : i32 to index
    %c0_166 = arith.constant 0 : index
    %c0_167 = arith.constant 0 : index
    %454 = vector.load %arg15[%453, %c0_166, %c0_167] : memref<6x2x16xf32, #tpu.memory_space<vmem>>, vector<1x2x16xf32>
    %455 = vector.shape_cast %454 : vector<1x2x16xf32> to vector<2x16xf32>
    %456 = vector.shape_cast %452 : vector<2x16xf32> to vector<1x2x16xf32>
    tpu.vector_store %arg15[%453, %c0_166, %c0_167], %456 {strides = array<i32>} : memref<6x2x16xf32, #tpu.memory_space<vmem>>, vector<1x2x16xf32>,
    %cst_168 = arith.constant dense<0.000000e+00> : vector<2x16xf32>
    %457 = tpu.matmul %448, %418, %cst_168 {dimension_numbers = #tpu.dot_dimension_numbers<[1], [0], [0], [1], [0, 0, 1, 1], [], []>} : vector<2x32xf32>, vector<32x16xf32>, vector<2x16xf32> -> vector<2x16xf32>
    %c3_i32_169 = arith.constant 3 : i32
    %458 = arith.index_cast %c3_i32_169 : i32 to index
    %c0_170 = arith.constant 0 : index
    %c0_171 = arith.constant 0 : index
    %459 = vector.load %arg14[%458, %c0_170, %c0_171] : memref<5x2x32xf32, #tpu.memory_space<vmem>>, vector<1x2x32xf32>
    %460 = vector.shape_cast %459 : vector<1x2x32xf32> to vector<2x32xf32>
    %cst_172 = arith.constant dense<0.000000e+00> : vector<2x16xf32>
    %461 = tpu.matmul %460, %419, %cst_172 {dimension_numbers = #tpu.dot_dimension_numbers<[1], [0], [0], [1], [0, 0, 1, 1], [], []>} : vector<2x32xf32>, vector<32x16xf32>, vector<2x16xf32> -> vector<2x16xf32>
    %462 = arith.addf %457, %461 : vector<2x16xf32>
    %463 = vector.broadcast %420 : vector<1x16xf32> to vector<2x16xf32>
    %464 = arith.addf %462, %463 : vector<2x16xf32>
    %465 = arith.index_cast %c3_i32_169 : i32 to index
    %c0_173 = arith.constant 0 : index
    %c0_174 = arith.constant 0 : index
    %466 = vector.load %arg15[%465, %c0_173, %c0_174] : memref<6x2x16xf32, #tpu.memory_space<vmem>>, vector<1x2x16xf32>
    %467 = vector.shape_cast %466 : vector<1x2x16xf32> to vector<2x16xf32>
    %468 = vector.shape_cast %464 : vector<2x16xf32> to vector<1x2x16xf32>
    tpu.vector_store %arg15[%465, %c0_173, %c0_174], %468 {strides = array<i32>} : memref<6x2x16xf32, #tpu.memory_space<vmem>>, vector<1x2x16xf32>,
    %cst_175 = arith.constant dense<0.000000e+00> : vector<2x16xf32>
    %469 = tpu.matmul %460, %418, %cst_175 {dimension_numbers = #tpu.dot_dimension_numbers<[1], [0], [0], [1], [0, 0, 1, 1], [], []>} : vector<2x32xf32>, vector<32x16xf32>, vector<2x16xf32> -> vector<2x16xf32>
    %c4_i32_176 = arith.constant 4 : i32
    %470 = arith.index_cast %c4_i32_176 : i32 to index
    %c0_177 = arith.constant 0 : index
    %c0_178 = arith.constant 0 : index
    %471 = vector.load %arg14[%470, %c0_177, %c0_178] : memref<5x2x32xf32, #tpu.memory_space<vmem>>, vector<1x2x32xf32>
    %472 = vector.shape_cast %471 : vector<1x2x32xf32> to vector<2x32xf32>
    %cst_179 = arith.constant dense<0.000000e+00> : vector<2x16xf32>
    %473 = tpu.matmul %472, %419, %cst_179 {dimension_numbers = #tpu.dot_dimension_numbers<[1], [0], [0], [1], [0, 0, 1, 1], [], []>} : vector<2x32xf32>, vector<32x16xf32>, vector<2x16xf32> -> vector<2x16xf32>
    %474 = arith.addf %469, %473 : vector<2x16xf32>
    %475 = vector.broadcast %420 : vector<1x16xf32> to vector<2x16xf32>
    %476 = arith.addf %474, %475 : vector<2x16xf32>
    %477 = arith.index_cast %c4_i32_176 : i32 to index
    %c0_180 = arith.constant 0 : index
    %c0_181 = arith.constant 0 : index
    %478 = vector.load %arg15[%477, %c0_180, %c0_181] : memref<6x2x16xf32, #tpu.memory_space<vmem>>, vector<1x2x16xf32>
    %479 = vector.shape_cast %478 : vector<1x2x16xf32> to vector<2x16xf32>
    %480 = vector.shape_cast %476 : vector<2x16xf32> to vector<1x2x16xf32>
    tpu.vector_store %arg15[%477, %c0_180, %c0_181], %480 {strides = array<i32>} : memref<6x2x16xf32, #tpu.memory_space<vmem>>, vector<1x2x16xf32>,
    %cst_182 = arith.constant dense<0.000000e+00> : vector<2x16xf32>
    %481 = tpu.matmul %472, %418, %cst_182 {dimension_numbers = #tpu.dot_dimension_numbers<[1], [0], [0], [1], [0, 0, 1, 1], [], []>} : vector<2x32xf32>, vector<32x16xf32>, vector<2x16xf32> -> vector<2x16xf32>
    %c5_i32_183 = arith.constant 5 : i32
    %482 = vector.broadcast %420 : vector<1x16xf32> to vector<2x16xf32>
    %483 = arith.addf %481, %482 : vector<2x16xf32>
    %c5 = arith.constant 5 : index
    %c0_184 = arith.constant 0 : index
    %c0_185 = arith.constant 0 : index
    %484 = vector.load %arg15[%c5, %c0_184, %c0_185] : memref<6x2x16xf32, #tpu.memory_space<vmem>>, vector<1x2x16xf32>
    %485 = vector.shape_cast %484 : vector<1x2x16xf32> to vector<2x16xf32>
    %486 = vector.shape_cast %483 : vector<2x16xf32> to vector<1x2x16xf32>
    tpu.vector_store %arg15[%c5, %c0_184, %c0_185], %486 {strides = array<i32>} : memref<6x2x16xf32, #tpu.memory_space<vmem>>, vector<1x2x16xf32>,
    return
  }
  func.func @transform_0(%arg0: i32) -> (i32, i32, i32) {
    %c0_i32 = arith.constant 0 : i32
    %c0_i32_0 = arith.constant 0 : i32
    %c0_i32_1 = arith.constant 0 : i32
    return %c0_i32, %arg0, %c0_i32_0 : i32, i32, i32
  }
  func.func @transform_1(%arg0: i32) -> (i32, i32, i32) {
    %c0_i32 = arith.constant 0 : i32
    %c0_i32_0 = arith.constant 0 : i32
    %c0_i32_1 = arith.constant 0 : i32
    return %c0_i32, %arg0, %c0_i32_0 : i32, i32, i32
  }
  func.func @transform_2(%arg0: i32) -> (i32, i32, i32) {
    %c0_i32 = arith.constant 0 : i32
    %c0_i32_0 = arith.constant 0 : i32
    %c0_i32_1 = arith.constant 0 : i32
    %c0_i32_2 = arith.constant 0 : i32
    return %c0_i32, %c0_i32_0, %c0_i32_1 : i32, i32, i32
  }
  func.func @transform_3(%arg0: i32) -> (i32, i32, i32) {
    %c0_i32 = arith.constant 0 : i32
    %c0_i32_0 = arith.constant 0 : i32
    %c0_i32_1 = arith.constant 0 : i32
    %c0_i32_2 = arith.constant 0 : i32
    return %c0_i32, %c0_i32_0, %c0_i32_1 : i32, i32, i32
  }
  func.func @transform_4(%arg0: i32) -> (i32, i32) {
    %c0_i32 = arith.constant 0 : i32
    %c0_i32_0 = arith.constant 0 : i32
    %c0_i32_1 = arith.constant 0 : i32
    return %c0_i32, %c0_i32_0 : i32, i32
  }
  func.func @transform_5(%arg0: i32) -> (i32, i32) {
    %c0_i32 = arith.constant 0 : i32
    %c0_i32_0 = arith.constant 0 : i32
    %c0_i32_1 = arith.constant 0 : i32
    return %c0_i32, %c0_i32_0 : i32, i32
  }
  func.func @transform_6(%arg0: i32) -> (i32, i32) {
    %c0_i32 = arith.constant 0 : i32
    %c0_i32_0 = arith.constant 0 : i32
    %c0_i32_1 = arith.constant 0 : i32
    return %c0_i32, %c0_i32_0 : i32, i32
  }
  func.func @transform_7(%arg0: i32) -> (i32, i32) {
    %c0_i32 = arith.constant 0 : i32
    %c0_i32_0 = arith.constant 0 : i32
    %c0_i32_1 = arith.constant 0 : i32
    return %c0_i32, %c0_i32_0 : i32, i32
  }
  func.func @transform_8(%arg0: i32) -> (i32, i32) {
    %c0_i32 = arith.constant 0 : i32
    %c0_i32_0 = arith.constant 0 : i32
    %c0_i32_1 = arith.constant 0 : i32
    return %c0_i32, %c0_i32_0 : i32, i32
  }
  func.func @transform_9(%arg0: i32) -> (i32, i32) {
    %c0_i32 = arith.constant 0 : i32
    %c0_i32_0 = arith.constant 0 : i32
    %c0_i32_1 = arith.constant 0 : i32
    return %c0_i32, %c0_i32_0 : i32, i32
  }
  func.func @transform_10(%arg0: i32) -> (i32, i32) {
    %c0_i32 = arith.constant 0 : i32
    %c0_i32_0 = arith.constant 0 : i32
    %c0_i32_1 = arith.constant 0 : i32
    return %c0_i32, %c0_i32_0 : i32, i32
  }
  func.func @transform_11(%arg0: i32) -> (i32, i32) {
    %c0_i32 = arith.constant 0 : i32
    %c0_i32_0 = arith.constant 0 : i32
    %c0_i32_1 = arith.constant 0 : i32
    return %c0_i32, %c0_i32_0 : i32, i32
  }
  func.func @transform_12(%arg0: i32) -> (i32, i32) {
    %c0_i32 = arith.constant 0 : i32
    %c0_i32_0 = arith.constant 0 : i32
    %c0_i32_1 = arith.constant 0 : i32
    return %c0_i32, %c0_i32_0 : i32, i32
  }
  func.func @transform_13(%arg0: i32) -> (i32, i32, i32) {
    %c0_i32 = arith.constant 0 : i32
    %c0_i32_0 = arith.constant 0 : i32
    %c0_i32_1 = arith.constant 0 : i32
    return %c0_i32, %arg0, %c0_i32_0 : i32, i32, i32
  }
  func.func @transform_14(%arg0: i32) -> (i32, i32, i32) {
    %c0_i32 = arith.constant 0 : i32
    %c0_i32_0 = arith.constant 0 : i32
    %c0_i32_1 = arith.constant 0 : i32
    return %c0_i32, %arg0, %c0_i32_0 : i32, i32, i32
  }
}

</mosaic_0001>

<bundles_post_ra>
// kernel: tpu_custom_call.1
= control target key start
LH: loop header
LB: loop body
LE: loop exit
PB: predicated region body
PF: predicated region fallthrough
CT: control target
= control target key end

     0   :  { %20 = vsyncpa [#allocation6], 0  ;;  %vm53_vm0 = vcmask 123904   ;;  %s2084_s0 = inlined_call_operand.vmem [shape: f32[5,2,16], index: 0, kind: input, shape index: {}]   ;;  %s2085_s1 = inlined_call_operand.vmem [shape: f32[5,2,16], index: 1, kind: input, shape index: {}]   ;;  %s2086_s2 = inlined_call_operand.vmem [shape: f32[5,1,16], index: 2, kind: input, shape index: {}]   ;;  %s2087_s3 = inlined_call_operand.vmem [shape: f32[5,1,16], index: 3, kind: input, shape index: {}]   ;;  %s2088_s4 = inlined_call_operand.vmem [shape: f32[16,32], index: 4, kind: input, shape index: {}]   ;;  %s2089_s5 = inlined_call_operand.vmem [shape: f32[8,32], index: 5, kind: input, shape index: {}]   ;;  %s2090_s6 = inlined_call_operand.vmem [shape: f32[1,32], index: 6, kind: input, shape index: {}]   ;;  %s2091_s7 = inlined_call_operand.vmem [shape: f32[16,32], index: 7, kind: input, shape index: {}]   ;;  %s2092_s8 = inlined_call_operand.vmem [shape: f32[8,32], index: 8, kind: input, shape index: {}]   ;;  %s2093_s9 = inlined_call_operand.vmem [shape: f32[1,32], index: 9, kind: input, shape index: {}]   ;;  %s2094_s10 = inlined_call_operand.vmem [shape: f32[32,16], index: 10, kind: input, shape index: {}]   ;;  %s2095_s11 = inlined_call_operand.vmem [shape: f32[32,16], index: 11, kind: input, shape index: {}]   ;;  %s2096_s12 = inlined_call_operand.vmem [shape: f32[1,16], index: 12, kind: input, shape index: {}]   ;;  %s2097_s13 = inlined_call_operand.hbm [shape: f32[5,2,32], index: 13, kind: output, shape index: {0}]   ;;  %s2098_s14 = inlined_call_operand.hbm [shape: f32[6,2,16], index: 14, kind: output, shape index: {1}]  }
   0x1   :  { %v1720_v0 = vld [vmem:[%s2085_s1] sm:$0x3]  ;;  %v1725_v1 = vld [vmem:[%s2085_s1 + $0x2] sm:$0x3]  ;;  %v1730_v2 = vld [vmem:[%s2085_s1 + $0x4] sm:$0x3] }
   0x2   :  { %v1735_v3 = vld [vmem:[%s2085_s1 + $0x6] sm:$0x3]  ;;  %v1740_v4 = vld [vmem:[%s2085_s1 + $0x8] sm:$0x3]  ;;  %v63_v5 = vmul.f32 %v1720_v0, %v1720_v0  ;;  %v64_v6 = vmul.f32 %v1725_v1, %v1725_v1  ;;  %v65_v7 = vmul.f32 %v1730_v2, %v1730_v2  ;;  %v54_v8 = vsel %vm53_vm0, %v1720_v0, 0.0 }
   0x3   :  { %v55_v9 = vsel %vm53_vm0, %v1725_v1, 0.0  ;;  %v57_v10 = vsel %vm53_vm0, %v1730_v2, 0.0  ;;  %v66_v12 = vmul.f32 %v1735_v3, %v1735_v3  ;;  %v59_v13 = vsel %vm53_vm0, %v1735_v3, 0.0 }
   0x4   :  { %v56_v11 = vadd.f32 %v55_v9, %v54_v8  ;;  %v68_v14 = vsel %vm53_vm0, %v63_v5, 0.0  ;;  %v69_v15 = vsel %vm53_vm0, %v64_v6, 0.0  ;;  %v71_v16 = vsel %vm53_vm0, %v65_v7, 0.0 }
   0x5   :  { %v61_v18 = vsel %vm53_vm0, %v1740_v4, 0.0  ;;  %v70_v19 = vadd.f32 %v69_v15, %v68_v14  ;;  %v73_v20 = vsel %vm53_vm0, %v66_v12, 0.0  ;;  %v67_v21 = vmul.f32 %v1740_v4, %v1740_v4 }
   0x6   :  { %v58_v17 = vadd.f32 %v57_v10, %v56_v11 }
   0x7   :  { %v72_v23 = vadd.f32 %v71_v16, %v70_v19 }
   0x8   :  { %v60_v22 = vadd.f32 %v59_v13, %v58_v17 }
   0x9   :  { %21 = vsyncpa [#allocation8], 0  ;;  %v74_v25 = vadd.f32 %v73_v20, %v72_v23  ;;  %v75_v26 = vsel %vm53_vm0, %v67_v21, 0.0  ;;  %v1772_v35 = vld [vmem:[%s2092_s8] sm:$0xff]  ;;  %v1632_v37 = vmov 0.0   ;;  %v1778_v38 = vld [vmem:[%s2088_s4 + $0x8] sm:$0xff] }
   0xa   :  { %v62_v24 = vadd.f32 %v61_v18, %v60_v22  ;;  %241 = vmatpush.msra.mxu2 %v1772_v35  ;;  %v1783_v39 = vld [vmem:[%s2091_s7 + $0x8] sm:$0xff]  ;;  %v1788_v40 = vld [vmem:[%s2089_s5] sm:$0xff]  ;;  %214 = vmatpush.msra.mxu1 %v1778_v38  ;;  %vm196_vm4 = vcmask 130048   ;;  %s1633_s5 = smov 112   ;;  %vm351_vm13 = vcmask 58368   ;;  %vm172_vm14 = vcmask 64512  }
   0xb   :  { %v76_v28 = vadd.f32 %v75_v26, %v74_v25  ;;  %242 = vmatmul.f32.vlgmr.msra.gmra.mxu2 %v1632_v37  ;;  %263 = vmatpush.msra.mxu3 %v1783_v39  ;;  %v1795_v41 = vld [vmem:[%s2088_s4] sm:$0xff]  ;;  %s1637_s17 = smov 24   ;;  %s1407_s20 = sshll.u32 %s2097_s13, 4  ;;  %s1408_s20 = int_to_ptr.hbm [resolvable:$true] %s1407_s20 }
   0xc   :  { %v77_v27 = vsel %vm53_vm0, %v62_v24, 0.0  ;;  %v1800_v42 = vld [vmem:[%s2091_s7] sm:$0xff]  ;;  %400 = vmatpush.msrb.mxu2 %v1778_v38  ;;  %191 = vmatpush.msra.mxu0 %v1788_v40  ;;  %s1636_s7 = smov 104   ;;  %s1639_s21 = smov 32  }
   0xd   :  { %78 = vadd.xlane.f32.xlu0 %v77_v27  ;;  %v81_v29 = vsel %vm53_vm0, %v76_v28, 0.0  ;;  %215 = vmatpush.msra.mxu1 %v1795_v41  ;;  %v1485_v49 = vld [vmem:[%s2086_s2] ss:$0 sm:$0xff]  ;;  %v1486_v50 = vld [vmem:[%s2086_s2 + $0x1] ss:$0 sm:$0xff]  ;;  %s1640_s22 = smov 2  }
   0xe   :  { %264 = vmatpush.msra.mxu3 %v1800_v42  ;;  %401 = vmatpush.msrb.mxu2 %v1795_v41  ;;  %v1487_v56 = vld [vmem:[%s2086_s2 + $0x2] ss:$0 sm:$0xff]  ;;  %v1488_v57 = vld [vmem:[%s2086_s2 + $0x3] ss:$0 sm:$0xff]  ;;  %v1489_v59 = vld [vmem:[%s2086_s2 + $0x4] ss:$0 sm:$0xff] }
   0xf   :  { %192 = vmatmul.f32.vlgmr.msra.gmra.mxu0 %v1632_v37  ;;  %426 = vmatpush.msrb.mxu1 %v1772_v35  ;;  %v1490_v61 = vld [vmem:[%s2087_s3] ss:$0 sm:$0xff]  ;;  %v1491_v62 = vld [vmem:[%s2087_s3 + $0x1] ss:$0 sm:$0xff]  ;;  %v1492_v63 = vld [vmem:[%s2087_s3 + $0x2] ss:$0 sm:$0xff] }
  0x10   :  { %448 = vmatpush.msrb.mxu3 %v1783_v39  ;;  %582 = vmatpush.msra.mxu2 %v1778_v38  ;;  %v1494_v6 = vld [vmem:[%s2087_s3 + $0x4] ss:$0 sm:$0xff]  ;;  %v1878_v26 = vld [vmem:[%s2093_s9] ss:$0 sm:$0xff]  ;;  %s1635_s9 = smov 16   ;;  %s1420_s26 = sshll.u32 %s2098_s14, 4  ;;  %s1421_s26 = int_to_ptr.hbm [resolvable:$true] %s1420_s26 }
  0x11   :  { %378 = vmatpush.msrb.mxu0 %v1788_v40 }
  0x12   :  { %449 = vmatpush.msrb.mxu3 %v1800_v42  ;;  %583 = vmatpush.msra.mxu2 %v1795_v41 }
  0x13   :  { %560 = vmatpush.msra.mxu0 %v1788_v40 }
  0x15   :  { %82 = vadd.xlane.f32.xlu0 %v81_v29 }
  0x80   :  { %v79_v30 = vpop.xlane.xlu0 %78 }
  0x81   :  { %v80_v31 = vmul.f32 0.0125, %v79_v30 }
  0x83   :  { %v85_v33 = vmul.f32 %v80_v31, %v80_v31  ;;  %v98_v52 = vsub.f32 %v1720_v0, %v80_v31  ;;  %v99_v53 = vsub.f32 %v1725_v1, %v80_v31  ;;  %v100_v54 = vsub.f32 %v1730_v2, %v80_v31 }
  0x84   :  { %v101_v55 = vsub.f32 %v1735_v3, %v80_v31  ;;  %v102_v58 = vsub.f32 %v1740_v4, %v80_v31  ;;  %v1493_v4 = vld [vmem:[%s2087_s3 + $0x3] ss:$0 sm:$0xff] }
  0x88   :  { %v83_v32 = vpop.xlane.xlu0 %82 }
  0x89   :  { %v84_v34 = vmul.f32 0.0125, %v83_v32 }
  0x8b   :  { %v86_v36 = vsub.f32 %v84_v34, %v85_v33  ;;  %v1884_v34 = vld [vmem:[%s2090_s6] ss:$0 sm:$0xff]  ;;  %s1634_s6 = smov 8  }
  0x8c   :  { %v193_v30 = vpop.f32.mrf.mxu0 }
  0x8d   :  { %v87_v43 = vadd.f32 1e-05, %v86_v36 }
  0x8e   :  { %v243_v27 = vpop.f32.mrf.mxu2 }
  0x8f   :  { %1498 = vrsqrt.f32 %v87_v43  ;;  %vm94_vm2 = vweird.f32 %v87_v43 }
  0x95   :  { %v1499_v44 = vpop.eup %1498 }
  0x96   :  { %v89_v45 = vmul.f32 %v1499_v44, %v87_v43  ;;  %vm95_vm1 = vweird.f32 %v1499_v44 }
  0x97   :  { %vm96_vm3 = vmor %vm94_vm2, %vm95_vm1 }
  0x98   :  { %v90_v46 = vmul.f32 %v1499_v44, %v89_v45 }
  0x9a   :  { %v91_v47 = vmul.f32 0.5, %v90_v46 }
  0x9c   :  { %v92_v48 = vsub.f32 1.5, %v91_v47 }
  0x9e   :  { %v93_v51 = vmul.f32 %v1499_v44, %v92_v48 }
  0xa0   :  { %v97_v60 = vsel %vm96_vm3, %v1499_v44, %v93_v51 }
  0xa1   :  { %v103_v0 = vmul.f32 %v98_v52, %v97_v60  ;;  %v104_v1 = vmul.f32 %v99_v53, %v97_v60  ;;  %v105_v2 = vmul.f32 %v100_v54, %v97_v60  ;;  %v106_v3 = vmul.f32 %v101_v55, %v97_v60 }
  0xa2   :  { %v107_v5 = vmul.f32 %v102_v58, %v97_v60 }
  0xa3   :  { %v128_v7 = vmul.f32 %v1485_v49, %v103_v0  ;;  %v129_v8 = vmul.f32 %v1486_v50, %v104_v1  ;;  %v130_v9 = vmul.f32 %v1487_v56, %v105_v2  ;;  %v131_v10 = vmul.f32 %v1488_v57, %v106_v3 }
  0xa4   :  { %v132_v11 = vmul.f32 %v1489_v59, %v107_v5 }
  0xa5   :  { %v153_v12 = vadd.f32 %v1490_v61, %v128_v7  ;;  %v154_v13 = vadd.f32 %v1491_v62, %v129_v8  ;;  %v155_v14 = vadd.f32 %v1492_v63, %v130_v9  ;;  %v156_v15 = vadd.f32 %v1493_v4, %v131_v10 }
  0xa6   :  { %v157_v16 = vadd.f32 %v1494_v6, %v132_v11 }
  0xa7   :  { %158 = vst.msk [vmem:[#allocation2] sm:$0x3] %vm53_vm0, %v153_v12 }
  0xa8   :  { %159 = vst.msk [vmem:[#allocation2 + $0x2] sm:$0x3] %vm53_vm0, %v154_v13 }
  0xa9   :  { %160 = vst.msk [vmem:[#allocation2 + $0x4] sm:$0x3] %vm53_vm0, %v155_v14 }
  0xaa   :  { %161 = vst.msk [vmem:[#allocation2 + $0x6] sm:$0x3] %vm53_vm0, %v156_v15 }
  0xab   :  { %162 = vst.msk [vmem:[#allocation2 + $0x8] sm:$0x3] %vm53_vm0, %v157_v16 }
  0xae   :  { %v171_v17 = vld [vmem:[#allocation2] sm:$0x3] }
  0xaf   :  { %1437 = vmatmul.msk.f32.vlgmr.msra.gmra.mxu1 %vm196_vm4, %v171_v17  ;;  %v360_v18 = vld [vmem:[#allocation2 + $0x2] sm:$0x3]  ;;  %v945_v25 = vld [vmem:[#allocation2] sm:$0x3] }
  0xb0   :  { %1442 = vmatmul.msk.f32.vlgmr.msrb.gmra.mxu2 %vm196_vm4, %v360_v18  ;;  %606 = vmatpush.msra.mxu1 %v1772_v35  ;;  %v542_v20 = vld [vmem:[#allocation2 + $0x4] sm:$0x3]  ;;  %v765_v24 = vld [vmem:[#allocation2 + $0x2] sm:$0x3] }
  0xb1   :  { %758 = vmatpush.msrb.mxu2 %v1778_v38  ;;  %v408_v21 = vld [vmem:[#allocation2 + $0x6] sm:$0x3] }
  0xb2   :  { %v225_v19 = vld [vmem:[#allocation2 + $0x8] sm:$0x3]  ;;  %v718_v22 = vld [vmem:[#allocation2 + $0x6] sm:$0x3] }
  0xb3   :  { %1438 = vmatmul.msk.f32.vlgmr.msra.gmra.mxu3 %vm196_vm4, %v225_v19  ;;  %759 = vmatpush.msrb.mxu2 %v1795_v41  ;;  %v898_v23 = vld [vmem:[#allocation2 + $0x8] sm:$0x3] }
  0xb4   :  { %625 = vmatpush.msra.mxu3 %v1783_v39 }
  0xb6   :  { %626 = vmatpush.msra.mxu3 %v1800_v42 }
  0xb8   :  { %1448 = vmatmul.msk.f32.vlgmr.msra.gmra.mxu2 %vm196_vm4, %v542_v20 }
  0xb9   :  { %938 = vmatpush.msra.mxu2 %v1778_v38 }
  0xbb   :  { %1444 = vmatmul.msk.f32.vlgmr.msrb.gmra.mxu3 %vm196_vm4, %v408_v21  ;;  %939 = vmatpush.msra.mxu2 %v1795_v41 }
  0xbc   :  { %805 = vmatpush.msrb.mxu3 %v1783_v39 }
  0xbe   :  { %806 = vmatpush.msrb.mxu3 %v1800_v42 }
  0xc0   :  { %1454 = vmatmul.msk.f32.vlgmr.msrb.gmra.mxu2 %vm196_vm4, %v718_v22 }
  0xc3   :  { %1450 = vmatmul.msk.f32.vlgmr.msra.gmra.mxu3 %vm196_vm4, %v542_v20 }
  0xc4   :  { %985 = vmatpush.msra.mxu3 %v1783_v39 }
  0xc6   :  { %986 = vmatpush.msra.mxu3 %v1800_v42 }
  0xc8   :  { %1460 = vmatmul.msk.f32.vlgmr.msra.gmra.mxu2 %vm196_vm4, %v898_v23 }
  0xcb   :  { %1456 = vmatmul.msk.f32.vlgmr.msrb.gmra.mxu3 %vm196_vm4, %v765_v24 }
  0xd3   :  { %1462 = vmatmul.msk.f32.vlgmr.msra.gmra.mxu3 %vm196_vm4, %v945_v25 }
 0x12c   :  { %v217_v31 = vpop.f32.mrf.mxu1 }
 0x12d   :  { %v218_v33 = vadd.f32 %v217_v31, %v193_v30 }
 0x12f   :  { %v223_v36 = vadd.f32 %v1884_v34, %v218_v33 }
 0x131   :  { %v1439_v41 = vmul.f32 -1.442695, %v223_v36 }
 0x133   :  { %v403_v25 = vpop.f32.mrf.mxu2 }
 0x136   :  { %v266_v28 = vpop.f32.mrf.mxu3 }
 0x137   :  { %v267_v29 = vadd.f32 %v266_v28, %v243_v27 }
 0x139   :  { %v272_v32 = vadd.f32 %v1878_v26, %v267_v29 }
 0x13b   :  { %1500 = vtanh.f32 %v272_v32  ;;  %v1440_v39 = vmul.f32 -1.442695, %v272_v32 }
 0x13c   :  { %1502 = vtanh.f32 %v223_v36 }
 0x13d   :  { %1504 = vpow2.f32 %v1440_v39 }
 0x13e   :  { %1506 = vpow2.f32 %v1439_v41  ;;  %v451_v20 = vpop.f32.mrf.mxu3 }
 0x141   :  { %v1501_v37 = vpop.eup %1500 }
 0x142   :  { %332 = vrot.lane.b32.xlu1 %v1501_v37, %s1633_s5  ;;  %v1503_v38 = vpop.eup %1502 }
 0x143   :  { %v1505_v42 = vpop.eup %1504 }
 0x144   :  { %v313_v43 = vadd.f32 1.0, %v1505_v42  ;;  %v1507_v44 = vpop.eup %1506 }
 0x145   :  { %v276_v45 = vadd.f32 1.0, %v1507_v44 }
 0x146   :  { %1508 = vrcp.f32 %v313_v43  ;;  %v325_v54 = vand.u32 2147483648, %v313_v43  ;;  %vm319_vm6 = vweird.f32 %v313_v43  ;;  %v323_v55 = vand.u32 2147483647, %v313_v43 }
 0x147   :  { %1510 = vrcp.f32 %v276_v45  ;;  %v288_v63 = vand.u32 2147483648, %v276_v45  ;;  %vm282_vm10 = vweird.f32 %v276_v45  ;;  %v286_v0 = vand.u32 2147483647, %v276_v45 }
 0x148   :  { %v326_v58 = vor.u32 1.1754944e-38, %v325_v54  ;;  %vm324_vm8 = vcmp.eq.f32.partialorder %v323_v55, 8.507059e+37 }
 0x149   :  { %v289_v2 = vor.u32 1.1754944e-38, %v288_v63  ;;  %vm287_vm12 = vcmp.eq.f32.partialorder %v286_v0, 8.507059e+37 }
 0x14a   :  { %295 = vrot.lane.b32.xlu1 %v1503_v38, %s1633_s5 }
 0x14c   :  { %v1509_v46 = vpop.eup %1508 }
 0x14d   :  { %v315_v47 = vmul.f32 %v1509_v46, %v313_v43  ;;  %v1511_v49 = vpop.eup %1510  ;;  %vm320_vm5 = vweird.f32 %v1509_v46 }
 0x14e   :  { %v278_v51 = vmul.f32 %v1511_v49, %v276_v45  ;;  %vm321_vm7 = vmor %vm319_vm6, %vm320_vm5  ;;  %vm283_vm9 = vweird.f32 %v1511_v49 }
 0x14f   :  { %v316_v48 = vsub.f32 1.0, %v315_v47  ;;  %vm284_vm11 = vmor %vm282_vm10, %vm283_vm9 }
 0x150   :  { %v279_v53 = vsub.f32 1.0, %v278_v51 }
 0x151   :  { %v317_v50 = vmul.f32 %v1509_v46, %v316_v48 }
 0x152   :  { %v280_v57 = vmul.f32 %v1511_v49, %v279_v53 }
 0x153   :  { %v318_v52 = vadd.f32 %v1509_v46, %v317_v50 }
 0x154   :  { %v281_v62 = vadd.f32 %v1511_v49, %v280_v57 }
 0x155   :  { %v322_v56 = vsel %vm321_vm7, %v1509_v46, %v318_v52 }
 0x156   :  { %v327_v60 = vsel %vm324_vm8, %v326_v58, %v322_v56  ;;  %v285_v1 = vsel %vm284_vm11, %v1511_v49, %v281_v62 }
 0x157   :  { %v290_v4 = vsel %vm287_vm12, %v289_v2, %v285_v1  ;;  %v330_v6 = vmul.f32 0.0, %v327_v60 }
 0x158   :  { %v293_v9 = vmul.f32 0.0, %v290_v4 }
 0x1b4   :  { %v333_v59 = vpop.permute.xlu1 %332 }
 0x1b5   :  { %v335_v61 = vmul.f32 %v333_v59, %v327_v60 }
 0x1b7   :  { %337 = vrot.lane.b32.xlu2 %v335_v61, %s1634_s6 }
 0x1bc   :  { %v296_v3 = vpop.permute.xlu1 %295 }
 0x1bd   :  { %v298_v5 = vmul.f32 %v296_v3, %v290_v4 }
 0x1bf   :  { %300 = vrot.lane.b32.xlu2 %v298_v5, %s1634_s6 }
 0x211   :  { %v338_v7 = vpop.permute.xlu2 %337 }
 0x212   :  { %v1891_v8 = vadd.f32 %v338_v7, %v330_v6 }
 0x214   :  { %1512 = vtanh.f32 %v1891_v8 }
 0x219   :  { %v301_v10 = vpop.permute.xlu2 %300 }
 0x21a   :  { %v1513_v11 = vpop.eup %1512  ;;  %v1894_v12 = vadd.f32 %v301_v10, %v293_v9 }
 0x21b   :  { %343 = vrot.lane.b32.xlu0 %v1513_v11, %s1635_s9 }
 0x21c   :  { %1514 = vtanh.f32 %v1894_v12 }
 0x222   :  { %v1515_v13 = vpop.eup %1514 }
 0x223   :  { %306 = vrot.lane.b32.xlu1 %v1515_v13, %s1635_s9 }
 0x28d   :  { %v344_v14 = vpop.permute.xlu0 %343 }
 0x28e   :  { %v346_v15 = vmul.f32 %v344_v14, %v327_v60  ;;  %v628_v14 = vpop.f32.mrf.mxu3 }
 0x290   :  { %354 = vrot.lane.b32.xlu2 %v346_v15, %s1636_s7 }
 0x295   :  { %v307_v16 = vpop.permute.xlu1 %306 }
 0x296   :  { %v309_v17 = vmul.f32 %v307_v16, %v290_v4 }
 0x298   :  { %348 = vrot.lane.b32.xlu1 %v309_v17, %s1636_s7 }
 0x2ea   :  { %v355_v18 = vpop.permute.xlu2 %354 }
 0x2eb   :  { %358 = vst.msk [vmem:[#allocation4 + $0x8] sm:$0x3] %vm351_vm13, %v355_v18  ;;  %1443 = vmatmul.msk.f32.vlgmr.msrb.gmra.mxu1 %vm172_vm14, %v355_v18 }
 0x2ec   :  { %783 = vmatpush.msrb.mxu1 %v1772_v35 }
 0x30a   :  { %v349_v19 = vpop.permute.xlu1 %348 }
 0x30b   :  { %352 = vst.msk [vmem:[#allocation3] sm:$0x3] %vm351_vm13, %v349_v19  ;;  %1441 = vmatmul.msk.f32.vlgmr.msrb.gmra.mxu0 %vm172_vm14, %v349_v19  ;;  %v585_v19 = vpop.f32.mrf.mxu2 }
 0x30c   :  { %736 = vmatpush.msrb.mxu0 %v1788_v40 }
 0x368   :  { %v428_v21 = vpop.f32.mrf.mxu1 }
 0x369   :  { %v452_v22 = vadd.f32 %v451_v20, %v428_v21 }
 0x36b   :  { %v454_v23 = vadd.f32 %v1878_v26, %v452_v22 }
 0x36d   :  { %1516 = vtanh.f32 %v454_v23  ;;  %v1446_v31 = vmul.f32 -1.442695, %v454_v23 }
 0x373   :  { %v1517_v24 = vpop.eup %1516 }
 0x374   :  { %514 = vrot.lane.b32.xlu2 %v1517_v24, %s1633_s5 }
 0x388   :  { %v380_v27 = vpop.f32.mrf.mxu0 }
 0x389   :  { %v404_v28 = vadd.f32 %v403_v25, %v380_v27 }
 0x38b   :  { %v406_v29 = vadd.f32 %v1884_v34, %v404_v28 }
 0x38d   :  { %1518 = vtanh.f32 %v406_v29  ;;  %v1445_v49 = vmul.f32 -1.442695, %v406_v29 }
 0x38e   :  { %1520 = vpow2.f32 %v1446_v31 }
 0x393   :  { %v1519_v30 = vpop.eup %1518 }
 0x394   :  { %477 = vrot.lane.b32.xlu1 %v1519_v30, %s1633_s5  ;;  %v1521_v32 = vpop.eup %1520 }
 0x395   :  { %v495_v33 = vadd.f32 1.0, %v1521_v32 }
 0x397   :  { %1522 = vrcp.f32 %v495_v33  ;;  %v507_v42 = vand.u32 2147483648, %v495_v33  ;;  %vm501_vm1 = vweird.f32 %v495_v33  ;;  %v505_v43 = vand.u32 2147483647, %v495_v33 }
 0x398   :  { %1524 = vpow2.f32 %v1445_v49 }
 0x399   :  { %v508_v45 = vor.u32 1.1754944e-38, %v507_v42  ;;  %vm506_vm3 = vcmp.eq.f32.partialorder %v505_v43, 8.507059e+37 }
 0x39d   :  { %v1523_v36 = vpop.eup %1522 }
 0x39e   :  { %v497_v37 = vmul.f32 %v1523_v36, %v495_v33  ;;  %vm502_vm15 = vweird.f32 %v1523_v36  ;;  %v1525_v50 = vpop.eup %1524 }
 0x39f   :  { %vm503_vm2 = vmor %vm501_vm1, %vm502_vm15  ;;  %v458_v51 = vadd.f32 1.0, %v1525_v50 }
 0x3a0   :  { %v498_v38 = vsub.f32 1.0, %v497_v37 }
 0x3a1   :  { %1526 = vrcp.f32 %v458_v51  ;;  %v470_v57 = vand.u32 2147483648, %v458_v51  ;;  %vm464_vm5 = vweird.f32 %v458_v51  ;;  %v468_v58 = vand.u32 2147483647, %v458_v51 }
 0x3a2   :  { %v499_v39 = vmul.f32 %v1523_v36, %v498_v38 }
 0x3a3   :  { %v471_v60 = vor.u32 1.1754944e-38, %v470_v57  ;;  %vm469_vm7 = vcmp.eq.f32.partialorder %v468_v58, 8.507059e+37 }
 0x3a4   :  { %v500_v41 = vadd.f32 %v1523_v36, %v499_v39 }
 0x3a6   :  { %v504_v44 = vsel %vm503_vm2, %v1523_v36, %v500_v41 }
 0x3a7   :  { %v509_v47 = vsel %vm506_vm3, %v508_v45, %v504_v44  ;;  %v1527_v52 = vpop.eup %1526 }
 0x3a8   :  { %v460_v53 = vmul.f32 %v1527_v52, %v458_v51  ;;  %vm465_vm4 = vweird.f32 %v1527_v52  ;;  %v512_v0 = vmul.f32 %v509_v47, %v1891_v8 }
 0x3a9   :  { %vm466_vm6 = vmor %vm464_vm5, %vm465_vm4 }
 0x3aa   :  { %v461_v54 = vsub.f32 1.0, %v460_v53 }
 0x3ac   :  { %v462_v55 = vmul.f32 %v1527_v52, %v461_v54 }
 0x3ae   :  { %v463_v56 = vadd.f32 %v1527_v52, %v462_v55 }
 0x3b0   :  { %v467_v59 = vsel %vm466_vm6, %v1527_v52, %v463_v56 }
 0x3b1   :  { %v472_v62 = vsel %vm469_vm7, %v471_v60, %v467_v59 }
 0x3b2   :  { %v475_v4 = vmul.f32 %v472_v62, %v1894_v12 }
 0x3ce   :  { %v515_v46 = vpop.permute.xlu2 %514 }
 0x3cf   :  { %v517_v48 = vmul.f32 %v515_v46, %v509_v47 }
 0x3d1   :  { %519 = vrot.lane.b32.xlu2 %v517_v48, %s1634_s6 }
 0x406   :  { %v478_v61 = vpop.permute.xlu1 %477 }
 0x407   :  { %v480_v63 = vmul.f32 %v478_v61, %v472_v62 }
 0x409   :  { %482 = vrot.lane.b32.xlu0 %v480_v63, %s1634_s6 }
 0x42b   :  { %v520_v1 = vpop.permute.xlu2 %519 }
 0x42c   :  { %v1914_v2 = vadd.f32 %v520_v1, %v512_v0 }
 0x42e   :  { %1528 = vtanh.f32 %v1914_v2 }
 0x434   :  { %v1529_v3 = vpop.eup %1528 }
 0x435   :  { %525 = vrot.lane.b32.xlu1 %v1529_v3, %s1635_s9 }
 0x47b   :  { %v483_v5 = vpop.permute.xlu0 %482 }
 0x47c   :  { %v1919_v6 = vadd.f32 %v483_v5, %v475_v4 }
 0x47e   :  { %1530 = vtanh.f32 %v1919_v6 }
 0x484   :  { %v1531_v7 = vpop.eup %1530 }
 0x485   :  { %488 = vrot.lane.b32.xlu2 %v1531_v7, %s1635_s9 }
 0x4a7   :  { %v526_v9 = vpop.permute.xlu1 %525 }
 0x4a8   :  { %v528_v8 = vmul.f32 %v526_v9, %v509_v47 }
 0x4aa   :  { %536 = vrot.lane.b32.xlu0 %v528_v8, %s1636_s7 }
 0x4df   :  { %v489_v10 = vpop.permute.xlu2 %488 }
 0x4e0   :  { %v491_v11 = vmul.f32 %v489_v10, %v472_v62 }
 0x4e2   :  { %530 = vrot.lane.b32.xlu1 %v491_v11, %s1636_s7  ;;  %v761_v11 = vpop.f32.mrf.mxu2 }
 0x51c   :  { %v537_v13 = vpop.permute.xlu0 %536 }
 0x51d   :  { %540 = vst.msk [vmem:[#allocation4 + $0x6] sm:$0x3] %vm351_vm13, %v537_v13  ;;  %1449 = vmatmul.msk.f32.vlgmr.msra.gmra.mxu1 %vm172_vm14, %v537_v13 }
 0x51e   :  { %963 = vmatpush.msra.mxu1 %v1772_v35 }
 0x554   :  { %v531_v12 = vpop.permute.xlu1 %530 }
 0x555   :  { %534 = vst.msk [vmem:[#allocation3 + $0x2] sm:$0x3] %vm351_vm13, %v531_v12  ;;  %1447 = vmatmul.msk.f32.vlgmr.msra.gmra.mxu0 %vm172_vm14, %v531_v12 }
 0x556   :  { %916 = vmatpush.msra.mxu0 %v1788_v40 }
 0x59a   :  { %v608_v15 = vpop.f32.mrf.mxu1 }
 0x59b   :  { %v629_v16 = vadd.f32 %v628_v14, %v608_v15 }
 0x59d   :  { %v631_v17 = vadd.f32 %v1878_v26, %v629_v16 }
 0x59f   :  { %1532 = vtanh.f32 %v631_v17  ;;  %v1452_v20 = vmul.f32 -1.442695, %v631_v17 }
 0x5a1   :  { %1534 = vpow2.f32 %v1452_v20 }
 0x5a5   :  { %v1533_v18 = vpop.eup %1532 }
 0x5a6   :  { %691 = vrot.lane.b32.xlu2 %v1533_v18, %s1633_s5 }
 0x5a7   :  { %v1535_v23 = vpop.eup %1534 }
 0x5a8   :  { %v672_v40 = vadd.f32 1.0, %v1535_v23 }
 0x5aa   :  { %v684_v31 = vand.u32 2147483648, %v672_v40  ;;  %vm678_vm9 = vweird.f32 %v672_v40  ;;  %v682_v32 = vand.u32 2147483647, %v672_v40 }
 0x5ac   :  { %v685_v36 = vor.u32 1.1754944e-38, %v684_v31  ;;  %vm683_vm11 = vcmp.eq.f32.partialorder %v682_v32, 8.507059e+37 }
 0x5d2   :  { %v562_v21 = vpop.f32.mrf.mxu0 }
 0x5d3   :  { %v586_v35 = vadd.f32 %v585_v19, %v562_v21 }
 0x5d5   :  { %v588_v22 = vadd.f32 %v1884_v34, %v586_v35 }
 0x5d7   :  { %1536 = vtanh.f32 %v588_v22  ;;  %v1451_v41 = vmul.f32 -1.442695, %v588_v22 }
 0x5d8   :  { %1538 = vrcp.f32 %v672_v40 }
 0x5d9   :  { %1540 = vpow2.f32 %v1451_v41 }
 0x5dd   :  { %v1537_v24 = vpop.eup %1536 }
 0x5de   :  { %654 = vrot.lane.b32.xlu0 %v1537_v24, %s1633_s5  ;;  %v1539_v25 = vpop.eup %1538 }
 0x5df   :  { %v674_v27 = vmul.f32 %v1539_v25, %v672_v40  ;;  %vm679_vm8 = vweird.f32 %v1539_v25  ;;  %v1541_v42 = vpop.eup %1540 }
 0x5e0   :  { %vm680_vm10 = vmor %vm678_vm9, %vm679_vm8  ;;  %v635_v43 = vadd.f32 1.0, %v1541_v42 }
 0x5e1   :  { %v675_v28 = vsub.f32 1.0, %v674_v27 }
 0x5e2   :  { %1542 = vrcp.f32 %v635_v43  ;;  %v647_v49 = vand.u32 2147483648, %v635_v43  ;;  %vm641_vm15 = vweird.f32 %v635_v43  ;;  %v645_v50 = vand.u32 2147483647, %v635_v43 }
 0x5e3   :  { %v676_v29 = vmul.f32 %v1539_v25, %v675_v28 }
 0x5e4   :  { %v648_v52 = vor.u32 1.1754944e-38, %v647_v49  ;;  %vm646_vm2 = vcmp.eq.f32.partialorder %v645_v50, 8.507059e+37 }
 0x5e5   :  { %v677_v30 = vadd.f32 %v1539_v25, %v676_v29 }
 0x5e7   :  { %v681_v33 = vsel %vm680_vm10, %v1539_v25, %v677_v30 }
 0x5e8   :  { %v686_v37 = vsel %vm683_vm11, %v685_v36, %v681_v33  ;;  %v1543_v44 = vpop.eup %1542 }
 0x5e9   :  { %v637_v45 = vmul.f32 %v1543_v44, %v635_v43  ;;  %vm642_vm12 = vweird.f32 %v1543_v44  ;;  %v689_v56 = vmul.f32 %v686_v37, %v1914_v2 }
 0x5ea   :  { %vm643_vm1 = vmor %vm641_vm15, %vm642_vm12 }
 0x5eb   :  { %v638_v46 = vsub.f32 1.0, %v637_v45 }
 0x5ed   :  { %v639_v47 = vmul.f32 %v1543_v44, %v638_v46 }
 0x5ef   :  { %v640_v48 = vadd.f32 %v1543_v44, %v639_v47 }
 0x5f1   :  { %v644_v51 = vsel %vm643_vm1, %v1543_v44, %v640_v48 }
 0x5f2   :  { %v649_v54 = vsel %vm646_vm2, %v648_v52, %v644_v51 }
 0x5f3   :  { %v652_v60 = vmul.f32 %v649_v54, %v1919_v6  ;;  %v808_v6 = vpop.f32.mrf.mxu3 }
 0x600   :  { %v692_v38 = vpop.permute.xlu2 %691 }
 0x601   :  { %v694_v39 = vmul.f32 %v692_v38, %v686_v37 }
 0x603   :  { %696 = vrot.lane.b32.xlu1 %v694_v39, %s1634_s6 }
 0x650   :  { %v655_v53 = vpop.permute.xlu0 %654 }
 0x651   :  { %v657_v55 = vmul.f32 %v655_v53, %v649_v54 }
 0x653   :  { %659 = vrot.lane.b32.xlu2 %v657_v55, %s1634_s6 }
 0x675   :  { %v697_v57 = vpop.permute.xlu1 %696 }
 0x676   :  { %v1938_v58 = vadd.f32 %v697_v57, %v689_v56 }
 0x678   :  { %1544 = vtanh.f32 %v1938_v58 }
 0x67e   :  { %v1545_v59 = vpop.eup %1544 }
 0x67f   :  { %702 = vrot.lane.b32.xlu0 %v1545_v59, %s1635_s9 }
 0x6ad   :  { %v660_v61 = vpop.permute.xlu2 %659 }
 0x6ae   :  { %v1943_v62 = vadd.f32 %v660_v61, %v652_v60 }
 0x6b0   :  { %1546 = vtanh.f32 %v1943_v62 }
 0x6b6   :  { %v1547_v63 = vpop.eup %1546 }
 0x6b7   :  { %665 = vrot.lane.b32.xlu1 %v1547_v63, %s1635_s9 }
 0x6f1   :  { %v703_v0 = vpop.permute.xlu0 %702 }
 0x6f2   :  { %v705_v1 = vmul.f32 %v703_v0, %v686_v37 }
 0x6f4   :  { %713 = vrot.lane.b32.xlu2 %v705_v1, %s1636_s7 }
 0x729   :  { %v666_v2 = vpop.permute.xlu1 %665 }
 0x72a   :  { %v668_v3 = vmul.f32 %v666_v2, %v649_v54 }
 0x72c   :  { %707 = vrot.lane.b32.xlu0 %v668_v3, %s1636_s7  ;;  %v941_v3 = vpop.f32.mrf.mxu2 }
 0x74e   :  { %v714_v4 = vpop.permute.xlu2 %713 }
 0x74f   :  { %717 = vst.msk [vmem:[#allocation4 + $0x4] sm:$0x3] %vm351_vm13, %v714_v4  ;;  %1455 = vmatmul.msk.f32.vlgmr.msrb.gmra.mxu1 %vm172_vm14, %v714_v4 }
 0x79e   :  { %v708_v5 = vpop.permute.xlu0 %707 }
 0x79f   :  { %711 = vst.msk [vmem:[#allocation3 + $0x4] sm:$0x3] %vm351_vm13, %v708_v5  ;;  %1453 = vmatmul.msk.f32.vlgmr.msrb.gmra.mxu0 %vm172_vm14, %v708_v5 }
 0x7cc   :  { %v785_v7 = vpop.f32.mrf.mxu1 }
 0x7cd   :  { %v809_v9 = vadd.f32 %v808_v6, %v785_v7 }
 0x7cf   :  { %v811_v8 = vadd.f32 %v1878_v26, %v809_v9 }
 0x7d1   :  { %1548 = vtanh.f32 %v811_v8  ;;  %v1458_v13 = vmul.f32 -1.442695, %v811_v8 }
 0x7d3   :  { %1550 = vpow2.f32 %v1458_v13 }
 0x7d7   :  { %v1549_v10 = vpop.eup %1548 }
 0x7d8   :  { %871 = vrot.lane.b32.xlu1 %v1549_v10, %s1633_s5 }
 0x7d9   :  { %v1551_v16 = vpop.eup %1550 }
 0x7da   :  { %v852_v18 = vadd.f32 1.0, %v1551_v16 }
 0x7dc   :  { %v864_v23 = vand.u32 2147483648, %v852_v18  ;;  %vm858_vm4 = vweird.f32 %v852_v18  ;;  %v862_v24 = vand.u32 2147483647, %v852_v18 }
 0x7de   :  { %v865_v25 = vor.u32 1.1754944e-38, %v864_v23  ;;  %vm863_vm6 = vcmp.eq.f32.partialorder %v862_v24, 8.507059e+37 }
 0x81c   :  { %v738_v12 = vpop.f32.mrf.mxu0 }
 0x81d   :  { %v762_v14 = vadd.f32 %v761_v11, %v738_v12 }
 0x81f   :  { %v764_v15 = vadd.f32 %v1884_v34, %v762_v14 }
 0x821   :  { %1552 = vtanh.f32 %v764_v15  ;;  %v1457_v30 = vmul.f32 -1.442695, %v764_v15 }
 0x822   :  { %1554 = vrcp.f32 %v852_v18 }
 0x823   :  { %1556 = vpow2.f32 %v1457_v30 }
 0x827   :  { %v1553_v17 = vpop.eup %1552 }
 0x828   :  { %834 = vrot.lane.b32.xlu2 %v1553_v17, %s1633_s5  ;;  %v1555_v19 = vpop.eup %1554 }
 0x829   :  { %v854_v20 = vmul.f32 %v1555_v19, %v852_v18  ;;  %vm859_vm3 = vweird.f32 %v1555_v19  ;;  %v1557_v31 = vpop.eup %1556 }
 0x82a   :  { %vm860_vm5 = vmor %vm858_vm4, %vm859_vm3  ;;  %v815_v32 = vadd.f32 1.0, %v1557_v31 }
 0x82b   :  { %v855_v21 = vsub.f32 1.0, %v854_v20 }
 0x82c   :  { %1558 = vrcp.f32 %v815_v32  ;;  %v827_v41 = vand.u32 2147483648, %v815_v32  ;;  %vm821_vm8 = vweird.f32 %v815_v32  ;;  %v825_v42 = vand.u32 2147483647, %v815_v32 }
 0x82d   :  { %v856_v35 = vmul.f32 %v1555_v19, %v855_v21 }
 0x82e   :  { %v828_v44 = vor.u32 1.1754944e-38, %v827_v41  ;;  %vm826_vm10 = vcmp.eq.f32.partialorder %v825_v42, 8.507059e+37 }
 0x82f   :  { %v857_v22 = vadd.f32 %v1555_v19, %v856_v35 }
 0x831   :  { %v861_v40 = vsel %vm860_vm5, %v1555_v19, %v857_v22  ;;  %vm1112_vm5 = vcmask 189568  }
 0x832   :  { %v866_v28 = vsel %vm863_vm6, %v865_v25, %v861_v40  ;;  %v1559_v33 = vpop.eup %1558  ;;  %vm1143_vm6 = vcmask 255168  }
 0x833   :  { %v817_v36 = vmul.f32 %v1559_v33, %v815_v32  ;;  %vm822_vm7 = vweird.f32 %v1559_v33  ;;  %v869_v48 = vmul.f32 %v866_v28, %v1938_v58 }
 0x834   :  { %vm823_vm9 = vmor %vm821_vm8, %vm822_vm7  ;;  %vm1162_vm7 = vcmask 261120  }
 0x835   :  { %v818_v37 = vsub.f32 1.0, %v817_v36 }
 0x837   :  { %v819_v38 = vmul.f32 %v1559_v33, %v818_v37 }
 0x839   :  { %v820_v39 = vadd.f32 %v1559_v33, %v819_v38 }
 0x83b   :  { %v824_v43 = vsel %vm823_vm9, %v1559_v33, %v820_v39 }
 0x83c   :  { %v829_v45 = vsel %vm826_vm10, %v828_v44, %v824_v43 }
 0x83d   :  { %v832_v52 = vmul.f32 %v829_v45, %v1943_v62  ;;  %v988_v62 = vpop.f32.mrf.mxu3 }
 0x84a   :  { %v872_v27 = vpop.permute.xlu1 %871 }
 0x84b   :  { %v874_v29 = vmul.f32 %v872_v27, %v866_v28 }
 0x84d   :  { %876 = vrot.lane.b32.xlu0 %v874_v29, %s1634_s6 }
 0x882   :  { %v835_v46 = vpop.permute.xlu2 %834 }
 0x883   :  { %v837_v47 = vmul.f32 %v835_v46, %v829_v45  ;;  %v1088_v46 = vld [vmem:[#allocation3 + $0x2] sm:$0x3] }
 0x885   :  { %839 = vrot.lane.b32.xlu1 %v837_v47, %s1634_s6 }
 0x8bf   :  { %v877_v49 = vpop.permute.xlu0 %876 }
 0x8c0   :  { %v1960_v50 = vadd.f32 %v877_v49, %v869_v48 }
 0x8c2   :  { %1560 = vtanh.f32 %v1960_v50 }
 0x8c8   :  { %v1561_v51 = vpop.eup %1560 }
 0x8c9   :  { %882 = vrot.lane.b32.xlu2 %v1561_v51, %s1635_s9  ;;  %v1121_v51 = vld [vmem:[#allocation4 + $0x6] sm:$0x3] }
 0x8f7   :  { %v840_v53 = vpop.permute.xlu1 %839 }
 0x8f8   :  { %v1965_v54 = vadd.f32 %v840_v53, %v832_v52  ;;  %v1078_v52 = vld [vmem:[%s2084_s0 + $0x2] sm:$0x3] }
 0x8f9   :  { %1083 = vst.msk [vmem:[#allocation5 + $0x2] sm:$0x3] %vm53_vm0, %v1078_v52 }
 0x8fa   :  { %1562 = vtanh.f32 %v1965_v54 }
 0x900   :  { %v1563_v55 = vpop.eup %1562 }
 0x901   :  { %845 = vrot.lane.b32.xlu0 %v1563_v55, %s1635_s9 }
 0x923   :  { %v883_v56 = vpop.permute.xlu2 %882 }
 0x924   :  { %v885_v57 = vmul.f32 %v883_v56, %v866_v28  ;;  %v1087_v56 = vld [vmem:[#allocation3] sm:$0x3] }
 0x926   :  { %893 = vrot.lane.b32.xlu1 %v885_v57, %s1636_s7  ;;  %v1120_v57 = vld [vmem:[#allocation4 + $0x4] sm:$0x3] }
 0x973   :  { %v846_v58 = vpop.permute.xlu0 %845 }
 0x974   :  { %v848_v59 = vmul.f32 %v846_v58, %v829_v45  ;;  %v1156_v58 = vld [vmem:[%s2095_s11 + $0x18] sm:$0xff] }
 0x975   :  { %1204 = vmatpush.msrb.mxu2 %v1156_v58  ;;  %1252 = vmatpush.msrb.mxu3 %v1156_v58 }
 0x976   :  { %887 = vrot.lane.b32.xlu2 %v848_v59, %s1636_s7  ;;  %v1155_v59 = vld [vmem:[%s2095_s11 + $0x10] sm:$0xff]  ;;  %1178 = vmatpush.msrb.mxu0 %v1156_v58 }
 0x977   :  { %1205 = vmatpush.msrb.mxu2 %v1155_v59  ;;  %1253 = vmatpush.msrb.mxu3 %v1155_v59 }
 0x978   :  { %1179 = vmatpush.msrb.mxu0 %v1155_v59 }
 0x998   :  { %v894_v60 = vpop.permute.xlu1 %893 }
 0x999   :  { %897 = vst.msk [vmem:[#allocation4 + $0x2] sm:$0x3] %vm351_vm13, %v894_v60  ;;  %1461 = vmatmul.msk.f32.vlgmr.msra.gmra.mxu1 %vm172_vm14, %v894_v60  ;;  %v1079_v60 = vld [vmem:[%s2084_s0 + $0x4] sm:$0x3] }
 0x99a   :  { %1084 = vst.msk [vmem:[#allocation5 + $0x4] sm:$0x3] %vm53_vm0, %v1079_v60 }
 0x9a0   :  { %v1119_v49 = vld [vmem:[#allocation4 + $0x2] sm:$0x3] }
 0x9d0   :  { %v888_v61 = vpop.permute.xlu2 %887 }
 0x9d1   :  { %891 = vst.msk [vmem:[#allocation3 + $0x6] sm:$0x3] %vm351_vm13, %v888_v61  ;;  %1459 = vmatmul.msk.f32.vlgmr.msra.gmra.mxu0 %vm172_vm14, %v888_v61  ;;  %v1154_v61 = vld [vmem:[%s2095_s11 + $0x8] sm:$0xff] }
 0x9d2   :  { %1206 = vmatpush.msrb.mxu2 %v1154_v61  ;;  %1254 = vmatpush.msrb.mxu3 %v1154_v61 }
 0x9d3   :  { %1180 = vmatpush.msrb.mxu0 %v1154_v61 }
 0xa16   :  { %v965_v63 = vpop.f32.mrf.mxu1 }
 0xa17   :  { %v989_v0 = vadd.f32 %v988_v62, %v965_v63  ;;  %v1153_v62 = vld [vmem:[%s2095_s11] sm:$0xff] }
 0xa18   :  { %1207 = vmatpush.msrb.mxu2 %v1153_v62  ;;  %1255 = vmatpush.msrb.mxu3 %v1153_v62 }
 0xa19   :  { %v991_v1 = vadd.f32 %v1878_v26, %v989_v0  ;;  %1181 = vmatpush.msrb.mxu0 %v1153_v62 }
 0xa1a   :  { %1300 = vmatpush.msra.mxu2 %v1156_v58  ;;  %1348 = vmatpush.msra.mxu3 %v1156_v58 }
 0xa1b   :  { %1564 = vtanh.f32 %v991_v1  ;;  %v1464_v9 = vmul.f32 -1.442695, %v991_v1 }
 0xa1c   :  { %1301 = vmatpush.msra.mxu2 %v1155_v59  ;;  %1349 = vmatpush.msra.mxu3 %v1155_v59 }
 0xa1e   :  { %1302 = vmatpush.msra.mxu2 %v1154_v61  ;;  %1350 = vmatpush.msra.mxu3 %v1154_v61 }
 0xa20   :  { %1303 = vmatpush.msra.mxu2 %v1153_v62  ;;  %1351 = vmatpush.msra.mxu3 %v1153_v62 }
 0xa21   :  { %v1565_v2 = vpop.eup %1564 }
 0xa22   :  { %1051 = vrot.lane.b32.xlu0 %v1565_v2, %s1633_s5 }
 0xa4e   :  { %v918_v4 = vpop.f32.mrf.mxu0 }
 0xa4f   :  { %v942_v5 = vadd.f32 %v941_v3, %v918_v4  ;;  %v1090_v3 = vld [vmem:[#allocation3 + $0x6] sm:$0x3] }
 0xa51   :  { %v944_v6 = vadd.f32 %v1884_v34, %v942_v5  ;;  %v1122_v5 = vld [vmem:[#allocation4 + $0x8] sm:$0x3] }
 0xa53   :  { %1566 = vtanh.f32 %v944_v6  ;;  %v1463_v21 = vmul.f32 -1.442695, %v944_v6  ;;  %v1077_v6 = vld [vmem:[%s2084_s0] sm:$0x3] }
 0xa54   :  { %1568 = vpow2.f32 %v1464_v9  ;;  %1082 = vst.msk [vmem:[#allocation5] sm:$0x3] %vm53_vm0, %v1077_v6 }
 0xa59   :  { %v1567_v7 = vpop.eup %1566 }
 0xa5a   :  { %1014 = vrot.lane.b32.xlu1 %v1567_v7, %s1633_s5  ;;  %v1569_v8 = vpop.eup %1568 }
 0xa5b   :  { %v1032_v10 = vadd.f32 1.0, %v1569_v8 }
 0xa5d   :  { %1570 = vrcp.f32 %v1032_v10  ;;  %v1044_v15 = vand.u32 2147483648, %v1032_v10  ;;  %vm1038_vm11 = vweird.f32 %v1032_v10  ;;  %v1042_v16 = vand.u32 2147483647, %v1032_v10 }
 0xa5e   :  { %1572 = vpow2.f32 %v1463_v21 }
 0xa5f   :  { %v1045_v17 = vor.u32 1.1754944e-38, %v1044_v15  ;;  %vm1043_vm15 = vcmp.eq.f32.partialorder %v1042_v16, 8.507059e+37 }
 0xa63   :  { %v1571_v11 = vpop.eup %1570 }
 0xa64   :  { %v1034_v26 = vmul.f32 %v1571_v11, %v1032_v10  ;;  %vm1039_vm14 = vweird.f32 %v1571_v11  ;;  %v1573_v35 = vpop.eup %1572  ;;  %v1152_v10 = vld [vmem:[%s2094_s10 + $0x18] sm:$0xff] }
 0xa65   :  { %vm1040_vm12 = vmor %vm1038_vm11, %vm1039_vm14  ;;  %v995_v22 = vadd.f32 1.0, %v1573_v35  ;;  %1224 = vmatpush.msrb.mxu1 %v1152_v10  ;;  %1272 = vmatpush.msra.mxu0 %v1152_v10 }
 0xa66   :  { %v1035_v13 = vsub.f32 1.0, %v1034_v26  ;;  %v1080_v26 = vld [vmem:[%s2084_s0 + $0x6] sm:$0x3] }
 0xa67   :  { %1574 = vrcp.f32 %v995_v22  ;;  %v1007_v28 = vand.u32 2147483648, %v995_v22  ;;  %vm1001_vm2 = vweird.f32 %v995_v22  ;;  %v1005_v29 = vand.u32 2147483647, %v995_v22  ;;  %1085 = vst.msk [vmem:[#allocation5 + $0x6] sm:$0x3] %vm53_vm0, %v1080_v26 }
 0xa68   :  { %v1036_v12 = vmul.f32 %v1571_v11, %v1035_v13  ;;  %v1150_v13 = vld [vmem:[%s2094_s10 + $0x8] sm:$0xff] }
 0xa69   :  { %v1008_v31 = vor.u32 1.1754944e-38, %v1007_v28  ;;  %vm1006_vm4 = vcmp.eq.f32.partialorder %v1005_v29, 8.507059e+37 }
 0xa6a   :  { %v1037_v14 = vadd.f32 %v1571_v11, %v1036_v12 }
 0xa6c   :  { %v1041_v34 = vsel %vm1040_vm12, %v1571_v11, %v1037_v14  ;;  %v1151_v11 = vld [vmem:[%s2094_s10 + $0x10] sm:$0xff]  ;;  %v1149_v14 = vld [vmem:[%s2094_s10] sm:$0xff] }
 0xa6d   :  { %v1046_v19 = vsel %vm1043_vm15, %v1045_v17, %v1041_v34  ;;  %v1575_v23 = vpop.eup %1574  ;;  %1225 = vmatpush.msrb.mxu1 %v1151_v11  ;;  %1273 = vmatpush.msra.mxu0 %v1151_v11 }
 0xa6e   :  { %v997_v24 = vmul.f32 %v1575_v23, %v995_v22  ;;  %vm1002_vm1 = vweird.f32 %v1575_v23  ;;  %v1049_v37 = vmul.f32 %v1046_v19, %v1960_v50  ;;  %v1089_v50 = vld [vmem:[#allocation3 + $0x4] sm:$0x3] }
 0xa6f   :  { %vm1003_vm3 = vmor %vm1001_vm2, %vm1002_vm1  ;;  %1226 = vmatpush.msrb.mxu1 %v1150_v13  ;;  %1274 = vmatpush.msra.mxu0 %v1150_v13 }
 0xa70   :  { %v998_v40 = vsub.f32 1.0, %v997_v24 }
 0xa71   :  { %1227 = vmatpush.msrb.mxu1 %v1149_v14  ;;  %1275 = vmatpush.msra.mxu0 %v1149_v14 }
 0xa72   :  { %v999_v25 = vmul.f32 %v1575_v23, %v998_v40 }
 0xa73   :  { %1320 = vmatpush.msra.mxu1 %v1152_v10 }
 0xa74   :  { %v1000_v27 = vadd.f32 %v1575_v23, %v999_v25 }
 0xa75   :  { %1321 = vmatpush.msra.mxu1 %v1151_v11 }
 0xa76   :  { %v1004_v30 = vsel %vm1003_vm3, %v1575_v23, %v1000_v27  ;;  %v1497_v23 = vld [vmem:[%s2096_s12] ss:$0 sm:$0xff]  ;;  %s1641_s12 = smov [#allocation7]  }
 0xa77   :  { %v1009_v33 = vsel %vm1006_vm4, %v1008_v31, %v1004_v30  ;;  %1322 = vmatpush.msra.mxu1 %v1150_v13  ;;  %s1418_s13 = sshll.u32 %s1641_s12, 4  ;;  %s1419_s13 = int_to_ptr.vmem [resolvable:$true] %s1418_s13 }
 0xa78   :  { %v1012_v42 = vmul.f32 %v1009_v33, %v1965_v54 }
 0xa79   :  { %1323 = vmatpush.msra.mxu1 %v1149_v14 }
 0xa94   :  { %v1052_v18 = vpop.permute.xlu0 %1051 }
 0xa95   :  { %v1054_v20 = vmul.f32 %v1052_v18, %v1046_v19 }
 0xa97   :  { %1056 = vrot.lane.b32.xlu2 %v1054_v20, %s1634_s6  ;;  %v1081_v20 = vld [vmem:[%s2084_s0 + $0x8] sm:$0x3] }
 0xa98   :  { %1086 = vst.msk [vmem:[#allocation5 + $0x8] sm:$0x3] %vm53_vm0, %v1081_v20 }
 0xacc   :  { %v1015_v32 = vpop.permute.xlu1 %1014 }
 0xacd   :  { %v1017_v36 = vmul.f32 %v1015_v32, %v1009_v33 }
 0xacf   :  { %1019 = vrot.lane.b32.xlu0 %v1017_v36, %s1634_s6 }
 0xaf1   :  { %v1057_v38 = vpop.permute.xlu2 %1056 }
 0xaf2   :  { %v1059_v39 = vadd.f32 %v1057_v38, %v1049_v37 }
 0xaf4   :  { %1576 = vtanh.f32 %v1059_v39 }
 0xafa   :  { %v1577_v41 = vpop.eup %1576 }
 0xafb   :  { %1062 = vrot.lane.b32.xlu1 %v1577_v41, %s1635_s9 }
 0xb41   :  { %v1020_v43 = vpop.permute.xlu0 %1019 }
 0xb42   :  { %v1022_v44 = vadd.f32 %v1020_v43, %v1012_v42 }
 0xb44   :  { %1578 = vtanh.f32 %v1022_v44 }
 0xb4a   :  { %v1579_v45 = vpop.eup %1578 }
 0xb4b   :  { %1025 = vrot.lane.b32.xlu2 %v1579_v45, %s1635_s9 }
 0xb53   :  { %1099 = vrot.lane.b32.xlu2 %v1088_v46, %s1635_s9 }
 0xb6d   :  { %v1063_v47 = vpop.permute.xlu1 %1062 }
 0xb6e   :  { %v1065_v48 = vmul.f32 %v1063_v47, %v1046_v19 }
 0xb70   :  { %1073 = vrot.lane.b32.xlu0 %v1065_v48, %s1636_s7 }
 0xb78   :  { %1130 = vrot.lane.b32.xlu0 %v1119_v49, %s1637_s17 }
 0xb80   :  { %1101 = vrot.lane.b32.xlu0 %v1089_v50, %s1635_s9 }
 0xb88   :  { %1134 = vrot.lane.b32.xlu0 %v1121_v51, %s1637_s17 }
 0xba5   :  { %v1026_v53 = vpop.permute.xlu2 %1025 }
 0xba6   :  { %v1028_v54 = vmul.f32 %v1026_v53, %v1009_v33 }
 0xba8   :  { %1067 = vrot.lane.b32.xlu1 %v1028_v54, %s1636_s7 }
 0xbad   :  { %v1100_v55 = vpop.permute.xlu2 %1099 }
 0xbae   :  { %1114 = vst.msk [vmem:[#allocation5 + $0x2] sm:$0x3] %vm1112_vm5, %v1100_v55 }
 0xbb0   :  { %1097 = vrot.lane.b32.xlu1 %v1087_v56, %s1635_s9 }
 0xbb8   :  { %1132 = vrot.lane.b32.xlu1 %v1120_v57, %s1637_s17 }
 0xbe2   :  { %v1074_v63 = vpop.permute.xlu0 %1073 }
 0xbe3   :  { %1076 = vst.msk [vmem:[#allocation4] sm:$0x3] %vm351_vm13, %v1074_v63 }
 0xbea   :  { %v1131_v0 = vpop.permute.xlu0 %1130  ;;  %v1118_v1 = vld [vmem:[#allocation4] sm:$0x3] }
 0xbeb   :  { %1145 = vst.msk [vmem:[#allocation5 + $0x2] sm:$0x3] %vm1143_vm6, %v1131_v0  ;;  %1128 = vrot.lane.b32.xlu2 %v1118_v1, %s1637_s17 }
 0xbf2   :  { %v1102_v2 = vpop.permute.xlu0 %1101  ;;  %v1188_v4 = vld [vmem:[#allocation5 + $0x2] sm:$0x3] }
 0xbf3   :  { %1115 = vst.msk [vmem:[#allocation5 + $0x4] sm:$0x3] %vm1112_vm5, %v1102_v2  ;;  %1103 = vrot.lane.b32.xlu2 %v1090_v3, %s1635_s9  ;;  %1466 = vmatmul.msk.f32.vlgmr.msrb.gmra.mxu2 %vm1162_vm7, %v1188_v4 }
 0xbf4   :  { %1391 = vmatpush.msrb.mxu2 %v1152_v10 }
 0xbf6   :  { %1392 = vmatpush.msrb.mxu2 %v1151_v11 }
 0xbf8   :  { %1393 = vmatpush.msrb.mxu2 %v1150_v13 }
 0xbfa   :  { %1394 = vmatpush.msrb.mxu2 %v1149_v14  ;;  %v1135_v18 = vpop.permute.xlu0 %1134 }
 0xbfb   :  { %1136 = vrot.lane.b32.xlu2 %v1122_v5, %s1637_s17  ;;  %s1638_s17 = smov [#allocation5]  }
 0xbfc   :  { %s1405_s18 = sshll.u32 %s1638_s17, 4  ;;  %s1406_s18 = int_to_ptr.vmem [resolvable:$true] %s1405_s18 }
 0xc1a   :  { %v1068_v7 = vpop.permute.xlu1 %1067 }
 0xc1b   :  { %1071 = vst.msk [vmem:[#allocation3 + $0x8] sm:$0x3] %vm351_vm13, %v1068_v7 }
 0xc22   :  { %v1098_v9 = vpop.permute.xlu1 %1097  ;;  %v1091_v8 = vld [vmem:[#allocation3 + $0x8] sm:$0x3] }
 0xc23   :  { %1113 = vst.msk [vmem:[#allocation5] sm:$0x3] %vm1112_vm5, %v1098_v9  ;;  %1105 = vrot.lane.b32.xlu1 %v1091_v8, %s1635_s9 }
 0xc2a   :  { %v1133_v12 = vpop.permute.xlu1 %1132 }
 0xc2b   :  { %1146 = vst.msk [vmem:[#allocation5 + $0x4] sm:$0x3] %vm1143_vm6, %v1133_v12 }
 0xc32   :  { %v1236_v15 = vld [vmem:[#allocation5 + $0x4] sm:$0x3] }
 0xc33   :  { %1468 = vmatmul.msk.f32.vlgmr.msrb.gmra.mxu3 %vm1162_vm7, %v1236_v15 }
 0xc45   :  { %v1129_v16 = vpop.permute.xlu2 %1128 }
 0xc46   :  { %1144 = vst.msk [vmem:[#allocation5] sm:$0x3] %vm1143_vm6, %v1129_v16 }
 0xc4d   :  { %v1104_v34 = vpop.permute.xlu2 %1103  ;;  %v1158_v17 = vld [vmem:[#allocation5] sm:$0x3] }
 0xc4e   :  { %1116 = vst.msk [vmem:[#allocation5 + $0x6] sm:$0x3] %vm1112_vm5, %v1104_v34  ;;  %1465 = vmatmul.msk.f32.vlgmr.msrb.gmra.mxu0 %vm1162_vm7, %v1158_v17  ;;  %1467 = vmatmul.msk.f32.vlgmr.msrb.gmra.mxu1 %vm1162_vm7, %v1158_v17 }
 0xc4f   :  { %1147 = vst.msk [vmem:[#allocation5 + $0x6] sm:$0x3] %vm1143_vm6, %v1135_v18  ;;  %1368 = vmatpush.msrb.mxu0 %v1152_v10 }
 0xc51   :  { %1369 = vmatpush.msrb.mxu0 %v1151_v11 }
 0xc53   :  { %1370 = vmatpush.msrb.mxu0 %v1150_v13 }
 0xc55   :  { %1371 = vmatpush.msrb.mxu0 %v1149_v14  ;;  %v1137_v35 = vpop.permute.xlu2 %1136 }
 0xc56   :  { %1469 = vmatmul.msk.f32.vlgmr.msra.gmra.mxu0 %vm1162_vm7, %v1188_v4  ;;  %1471 = vmatmul.msk.f32.vlgmr.msra.gmra.mxu1 %vm1162_vm7, %v1236_v15  ;;  %v1284_v19 = vld [vmem:[#allocation5 + $0x6] sm:$0x3] }
 0xc57   :  { %1470 = vmatmul.msk.f32.vlgmr.msra.gmra.mxu2 %vm1162_vm7, %v1284_v19 }
 0xc5e   :  { %1473 = vmatmul.msk.f32.vlgmr.msrb.gmra.mxu0 %vm1162_vm7, %v1284_v19 }
 0xc76   :  { %v1209_v24 = vpop.f32.mrf.mxu2 }
 0xc95   :  { %v1106_v21 = vpop.permute.xlu1 %1105 }
 0xc96   :  { %1117 = vst.msk [vmem:[#allocation5 + $0x8] sm:$0x3] %vm1112_vm5, %v1106_v21 }
 0xc97   :  { %1148 = vst.msk [vmem:[#allocation5 + $0x8] sm:$0x3] %vm1143_vm6, %v1137_v35 }
 0xc98   :  { %1413 = dma.vmem_to_hbm [thread:$0]  %s1406_s18, 160, %s1408_s20, [#allocation6], %s1639_s21, %s1639_s21, %s1640_s22  }
 0xc9e   :  { %v1332_v22 = vld [vmem:[#allocation5 + $0x8] sm:$0x3] }
 0xc9f   :  { %1472 = vmatmul.msk.f32.vlgmr.msra.gmra.mxu3 %vm1162_vm7, %v1332_v22  ;;  %1474 = vmatmul.msk.f32.vlgmr.msrb.gmra.mxu2 %vm1162_vm7, %v1332_v22 }
 0xcb6   :  { %v1257_v30 = vpop.f32.mrf.mxu3 }
 0xccb   :  { %v1183_v40 = vpop.f32.mrf.mxu0  ;;  %v1229_v25 = vpop.f32.mrf.mxu1 }
 0xccc   :  { %v1184_v27 = vadd.f32 %v1497_v23, %v1183_v40  ;;  %v1230_v28 = vadd.f32 %v1229_v25, %v1209_v24 }
 0xcce   :  { %1186 = vst.msk [vmem:[#allocation7] sm:$0x3] %vm53_vm0, %v1184_v27  ;;  %v1232_v29 = vadd.f32 %v1497_v23, %v1230_v28 }
 0xcd0   :  { %1234 = vst.msk [vmem:[#allocation7 + $0x2] sm:$0x3] %vm53_vm0, %v1232_v29 }
 0xcd3   :  { %v1277_v31 = vpop.f32.mrf.mxu0  ;;  %v1325_v36 = vpop.f32.mrf.mxu1 }
 0xcd4   :  { %v1278_v32 = vadd.f32 %v1277_v31, %v1257_v30 }
 0xcd6   :  { %v1280_v33 = vadd.f32 %v1497_v23, %v1278_v32 }
 0xcd8   :  { %1282 = vst.msk [vmem:[#allocation7 + $0x4] sm:$0x3] %vm53_vm0, %v1280_v33 }
 0xcda   :  { %v1305_v37 = vpop.f32.mrf.mxu2 }
 0xcdb   :  { %v1326_v38 = vadd.f32 %v1325_v36, %v1305_v37  ;;  %v1373_v41 = vpop.f32.mrf.mxu0 }
 0xcdd   :  { %v1328_v39 = vadd.f32 %v1497_v23, %v1326_v38 }
 0xcdf   :  { %1330 = vst.msk [vmem:[#allocation7 + $0x6] sm:$0x3] %vm53_vm0, %v1328_v39 }
 0xd22   :  { %v1353_v42 = vpop.f32.mrf.mxu3  ;;  %v1396_v43 = vpop.f32.mrf.mxu2 }
 0xd23   :  { %v1374_v44 = vadd.f32 %v1373_v41, %v1353_v42  ;;  %v1397_v45 = vadd.f32 %v1497_v23, %v1396_v43 }
 0xd25   :  { %v1376_v46 = vadd.f32 %v1497_v23, %v1374_v44  ;;  %1400 = vst.msk [vmem:[#allocation7 + $0xa] sm:$0x3] %vm53_vm0, %v1397_v45 }
 0xd27   :  { %1378 = vst.msk [vmem:[#allocation7 + $0x8] sm:$0x3] %vm53_vm0, %v1376_v46 }
 0xd28   :  { %1426 = dma.vmem_to_hbm [thread:$0]  %s1419_s13, 192, %s1421_s26, [#allocation8], %s1639_s21, %s1639_s21, %s1640_s22  }
 0xd29   :  { %1628 = dma.done.wait [#allocation6], 160  }
 0xd2a   :  { %1629 = vsyncadd [#allocation6], 4294967136 }
 0xd2b   :  { %1630 = dma.done.wait [#allocation8], 192  }
 0xd2c   :  { %1631 = vsyncadd [#allocation8], 4294967104 }
 0xd2d   :  { %1435 = vsyncpa [#allocation6], 1 }
 0xd2e   :  { %1436 = vsyncpa [#allocation8], 1 }

</bundles_post_ra>
